<compile_context>
chip_gen: v7x
topology: tpu7x:2x2x1
jax: 0.10.0
libtpu: 0.0.40
codegen_flags: <defaults>
</compile_context>

<pallas_src>
import functools
import math

import jax
import jax.numpy as jnp
from jax.experimental import pallas as pl
from jax.experimental.pallas import tpu as pltpu


def _sigmoid(x):
    # Written explicitly (exp + reciprocal) to keep the Mosaic lowering simple.
    return 1.0 / (1.0 + jnp.exp(-x))


# --------------------------------------------------------------------------
# Kernels
# --------------------------------------------------------------------------
def _gcn_adj_kernel(x_ref, adj_ref, wcat_ref, bcat_ref, wout_ref, bout_ref,
                    out_ref, acc_ref, *, f_in):
    """Dense-adjacency path. Grid = (row tiles i, neighbor tiles k)."""
    k = pl.program_id(1)

    @pl.when(k == 0)
    def _():
        acc_ref[...] = jnp.zeros_like(acc_ref)

    # Fused support / support_ for this neighbor tile: (tk, 2*F_in).
    sup = jnp.dot(x_ref[...], wcat_ref[...],
                  preferred_element_type=jnp.float32) + bcat_ref[...]

    # Aggregate over neighbors: acc += adj[i, k] @ sup  -> (tm, 2*F_in).
    acc_ref[...] += jnp.dot(adj_ref[...], sup,
                            preferred_element_type=jnp.float32)

    @pl.when(k == pl.num_programs(1) - 1)
    def _():
        acc = acc_ref[...]
        gate = jnp.tanh(acc[:, :f_in]) * _sigmoid(acc[:, f_in:])
        out = jnp.dot(gate, wout_ref[...],
                      preferred_element_type=jnp.float32) + bout_ref[...]
        out_ref[...] = out.astype(out_ref.dtype)


def _gcn_scalar_kernel(x_ref, wcat_ref, bcat_ref, wout_ref, bout_ref, out_ref,
                       *, f_in, adj_scalar):
    """Scalar-adjacency path (forward's default adj=1.0). Grid = (row tiles,)."""
    sup = jnp.dot(x_ref[...], wcat_ref[...],
                  preferred_element_type=jnp.float32) + bcat_ref[...]
    sup = sup * jnp.float32(adj_scalar)
    gate = jnp.tanh(sup[:, :f_in]) * _sigmoid(sup[:, f_in:])
    out = jnp.dot(gate, wout_ref[...],
                  preferred_element_type=jnp.float32) + bout_ref[...]
    out_ref[...] = out.astype(out_ref.dtype)


# --------------------------------------------------------------------------
# Host-side helpers / wrapper
# --------------------------------------------------------------------------
def adj_norm(adj, symmetric):
    # TODO(synk): adj_norm is not defined in the provided source; this is the
    # standard GCN normalization (D^-1/2 A D^-1/2 for symmetric, D^-1 A else),
    # applied host-side before the kernel.
    deg = jnp.sum(adj, axis=1)
    if symmetric:
        d = jnp.where(deg > 0, 1.0 / jnp.sqrt(deg), 0.0)
        return adj * d[:, None] * d[None, :]
    d = jnp.where(deg > 0, 1.0 / deg, 0.0)
    return adj * d[:, None]


def _pick_row_tile(n, preferred):
    for t in (preferred, 256, 128, 64, 32, 16, 8):
        if t <= n and n % t == 0:
            return t
    return n          # full extent (always a legal block)


def _pick_lane_tile(n, preferred):
    # This tile lands on a lane (last) dimension -> must be %128 or full.
    for t in (preferred, 256, 128):
        if t <= n and n % t == 0:
            return t
    return n          # full extent


def graph_convolution(x, adj, params, *, norm='', tm=256, tk=256):
    """Forward of GraphConvolution. `adj` may be a python scalar or (N, N) array."""
    W1, b1, W1_, b1_, W, b = (params[k] for k in
                              ("W1", "b1", "W1_", "b1_", "W", "b"))
    # TODO(synk): to_dense(input) (sparse -> dense conversion) has no Pallas
    # equivalent here; inputs are assumed dense already.
    N, f_in = x.shape
    f_out = W.shape[1]

    wcat = jnp.concatenate([W1, W1_], axis=1)            # (F_in, 2*F_in)
    bcat = jnp.concatenate([b1, b1_], axis=0)[None, :]   # (1, 2*F_in)
    bout = b[None, :]                                    # (1, F_out)

    cparams_scalar = pltpu.CompilerParams(
        dimension_semantics=("parallel",),
        vmem_limit_bytes=32 * 1024 * 1024)
    cparams_adj = pltpu.CompilerParams(
        dimension_semantics=("parallel", "arbitrary"),
        vmem_limit_bytes=32 * 1024 * 1024)

    if isinstance(adj, (float, int)):
        tm = _pick_row_tile(N, tm)
        kernel = functools.partial(_gcn_scalar_kernel, f_in=f_in,
                                   adj_scalar=float(adj))
        return pl.pallas_call(
            kernel,
            out_shape=jax.ShapeDtypeStruct((N, f_out), jnp.float32),
            grid_spec=pltpu.PrefetchScalarGridSpec(
                num_scalar_prefetch=0,
                grid=(N // tm,),
                in_specs=[
                    pl.BlockSpec((tm, f_in), lambda i: (i, 0)),
                    pl.BlockSpec((f_in, 2 * f_in), lambda i: (0, 0)),
                    pl.BlockSpec((1, 2 * f_in), lambda i: (0, 0)),
                    pl.BlockSpec((f_in, f_out), lambda i: (0, 0)),
                    pl.BlockSpec((1, f_out), lambda i: (0, 0)),
                ],
                out_specs=pl.BlockSpec((tm, f_out), lambda i: (i, 0)),
            ),
            compiler_params=cparams_scalar,
        )(x, wcat, bcat, W, bout)

    # ---- dense adjacency path ----
    if norm == 'symmetric':
        adj = adj_norm(adj, True)
    elif norm == 'asymmetric':
        adj = adj_norm(adj, False)
    adj = adj.astype(jnp.float32)

    tm = _pick_row_tile(N, tm)
    tk = _pick_lane_tile(N, tk)

    kernel = functools.partial(_gcn_adj_kernel, f_in=f_in)
    return pl.pallas_call(
        kernel,
        out_shape=jax.ShapeDtypeStruct((N, f_out), jnp.float32),
        grid_spec=pltpu.PrefetchScalarGridSpec(
            num_scalar_prefetch=0,
            grid=(N // tm, N // tk),
            in_specs=[
                pl.BlockSpec((tk, f_in), lambda i, k: (k, 0)),        # x (neighbor rows)
                pl.BlockSpec((tm, tk), lambda i, k: (i, k)),          # adj tile
                pl.BlockSpec((f_in, 2 * f_in), lambda i, k: (0, 0)),  # [W1 | W1_]
                pl.BlockSpec((1, 2 * f_in), lambda i, k: (0, 0)),     # [b1 | b1_]
                pl.BlockSpec((f_in, f_out), lambda i, k: (0, 0)),     # final W
                pl.BlockSpec((1, f_out), lambda i, k: (0, 0)),        # final b
            ],
            out_specs=pl.BlockSpec((tm, f_out), lambda i, k: (i, 0)),
            scratch_shapes=[pltpu.VMEM((tm, 2 * f_in), jnp.float32)],
        ),
        compiler_params=cparams_adj,
    )(x, adj, wcat, bcat, W, bout)


def graph_convolution_reference(x, adj, params, *, norm=''):
    """Pure-JAX reference mirroring the PyTorch forward."""
    W1, b1, W1_, b1_, W, b = (params[k] for k in
                              ("W1", "b1", "W1_", "b1_", "W", "b"))
    support = x @ W1 + b1
    support_ = x @ W1_ + b1_
    if isinstance(adj, (float, int)):
        out1 = jnp.tanh(support * adj)
        out2 = jax.nn.sigmoid(support_ * adj)
    else:
        if norm == 'symmetric':
            adj = adj_norm(adj, True)
        elif norm == 'asymmetric':
            adj = adj_norm(adj, False)
        out1 = jnp.tanh(adj @ support)
        out2 = jax.nn.sigmoid(adj @ support_)
    return (out1 * out2) @ W + b


# --------------------------------------------------------------------------
# Demo / correctness check
# --------------------------------------------------------------------------
if __name__ == "__main__":
    # Lane-dense, MXU-friendly but still small shapes: 512 nodes, 128 features.
    N, F_in, F_out = 512, 128, 128

    key = jax.random.PRNGKey(0)
    ks = jax.random.split(key, 8)

    def linear_init(kw, kb, fan_in, fan_out):
        # PyTorch nn.Linear default init (U[-1/sqrt(fan_in), 1/sqrt(fan_in)]).
        bound = 1.0 / math.sqrt(fan_in)
        Wm = jax.random.uniform(kw, (fan_in, fan_out), jnp.float32, -bound, bound)
        bv = jax.random.uniform(kb, (fan_out,), jnp.float32, -bound, bound)
        return Wm, bv

    W1, b1 = linear_init(ks[0], ks[1], F_in, F_in)
    W1_, b1_ = linear_init(ks[2], ks[3], F_in, F_in)
    W, b = linear_init(ks[4], ks[5], F_in, F_out)
    params = dict(W1=W1, b1=b1, W1_=W1_, b1_=b1_, W=W, b=b)

    x = jax.random.normal(ks[6], (N, F_in), jnp.float32)
    adj = (jax.random.uniform(ks[7], (N, N)) > 0.9).astype(jnp.float32)
    adj = adj.at[jnp.arange(N), jnp.arange(N)].set(1.0)   # self loops

    # Dense-adjacency path (the graph case).
    out = graph_convolution(x, adj, params, norm='')
    out = jax.block_until_ready(out)
    ref = graph_convolution_reference(x, adj, params, norm='')
    assert out.shape == (N, F_out)
    assert jnp.allclose(out, ref, atol=2e-3, rtol=2e-3), "dense-adj mismatch vs reference"

    # Scalar-adjacency path (forward's default adj=1.0).
    out_s = graph_convolution(x, 1.0, params)
    out_s = jax.block_until_ready(out_s)
    ref_s = graph_convolution_reference(x, 1.0, params)
    assert jnp.allclose(out_s, ref_s, atol=2e-3, rtol=2e-3), "scalar-adj mismatch vs reference"

    print("KERNEL_OK")
</pallas_src>

<mosaic_0001>
module attributes {stable_mosaic.version = 11 : i64} {
  func.func @_gcn_adj_kernel(%arg0: i32, %arg1: i32, %arg2: memref<256x128xf32, #tpu.memory_space<vmem>>, %arg3: memref<256x256xf32, #tpu.memory_space<vmem>>, %arg4: memref<128x256xf32, #tpu.memory_space<vmem>>, %arg5: memref<1x256xf32, #tpu.memory_space<vmem>>, %arg6: memref<128x128xf32, #tpu.memory_space<vmem>>, %arg7: memref<1x128xf32, #tpu.memory_space<vmem>>, %arg8: memref<256x128xf32, #tpu.memory_space<vmem>>, %arg9: memref<256x256xf32, #tpu.memory_space<vmem>>) attributes {dimension_semantics = [#tpu.dimension_semantics<parallel>, #tpu.dimension_semantics<arbitrary>], iteration_bounds = array<i64: 2, 2>, scalar_prefetch = 0 : i64, scratch_operands = 1 : i64, tpu.core_type = #tpu.core_type<tc>, window_params = [{transform_indices = @transform_0, window_bounds = array<i64: 256, 128>}, {transform_indices = @transform_1, window_bounds = array<i64: 256, 256>}, {pipeline_mode = #tpu.pipeline_mode<synchronous>, transform_indices = @transform_2, window_bounds = array<i64: 128, 256>}, {pipeline_mode = #tpu.pipeline_mode<synchronous>, transform_indices = @transform_3, window_bounds = array<i64: 1, 256>}, {pipeline_mode = #tpu.pipeline_mode<synchronous>, transform_indices = @transform_4, window_bounds = array<i64: 128, 128>}, {pipeline_mode = #tpu.pipeline_mode<synchronous>, transform_indices = @transform_5, window_bounds = array<i64: 1, 128>}, {transform_indices = @transform_6, window_bounds = array<i64: 256, 128>}]} {
    %c0_i32 = arith.constant 0 : i32
    %0 = arith.cmpi eq, %arg1, %c0_i32 : i32
    %1 = arith.extui %0 : i1 to i32
    %c0_i32_0 = arith.constant 0 : i32
    %2 = arith.cmpi ne, %1, %c0_i32_0 : i32
    scf.if %2 {
      %cst_14 = arith.constant 0.000000e+00 : f32
      %17 = vector.broadcast %cst_14 : f32 to vector<256x256xf32>
      %c0_15 = arith.constant 0 : index
      %c0_16 = arith.constant 0 : index
      %18 = vector.load %arg9[%c0_15, %c0_16] : memref<256x256xf32, #tpu.memory_space<vmem>>, vector<256x256xf32>
      tpu.vector_store %arg9[%c0_15, %c0_16], %17 {strides = array<i32>} : memref<256x256xf32, #tpu.memory_space<vmem>>, vector<256x256xf32>,
    } else {
    }
    %c0 = arith.constant 0 : index
    %c0_1 = arith.constant 0 : index
    %3 = vector.load %arg2[%c0, %c0_1] : memref<256x128xf32, #tpu.memory_space<vmem>>, vector<256x128xf32>
    %c0_2 = arith.constant 0 : index
    %c0_3 = arith.constant 0 : index
    %4 = vector.load %arg4[%c0_2, %c0_3] : memref<128x256xf32, #tpu.memory_space<vmem>>, vector<128x256xf32>
    %cst = arith.constant dense<0.000000e+00> : vector<256x256xf32>
    %5 = tpu.matmul %3, %4, %cst {dimension_numbers = #tpu.dot_dimension_numbers<[1], [0], [0], [1], [0, 0, 1, 1], [], []>} : vector<256x128xf32>, vector<128x256xf32>, vector<256x256xf32> -> vector<256x256xf32>
    %c0_4 = arith.constant 0 : index
    %c0_5 = arith.constant 0 : index
    %6 = vector.load %arg5[%c0_4, %c0_5] : memref<1x256xf32, #tpu.memory_space<vmem>>, vector<1x256xf32>
    %7 = vector.broadcast %6 : vector<1x256xf32> to vector<256x256xf32>
    %8 = arith.addf %5, %7 : vector<256x256xf32>
    %c0_6 = arith.constant 0 : index
    %c0_7 = arith.constant 0 : index
    %9 = vector.load %arg9[%c0_6, %c0_7] : memref<256x256xf32, #tpu.memory_space<vmem>>, vector<256x256xf32>
    %c0_8 = arith.constant 0 : index
    %c0_9 = arith.constant 0 : index
    %10 = vector.load %arg3[%c0_8, %c0_9] : memref<256x256xf32, #tpu.memory_space<vmem>>, vector<256x256xf32>
    %cst_10 = arith.constant dense<0.000000e+00> : vector<256x256xf32>
    %11 = tpu.matmul %10, %8, %cst_10 {dimension_numbers = #tpu.dot_dimension_numbers<[1], [0], [0], [1], [0, 0, 1, 1], [], []>} : vector<256x256xf32>, vector<256x256xf32>, vector<256x256xf32> -> vector<256x256xf32>
    %12 = arith.addf %9, %11 : vector<256x256xf32>
    %c0_11 = arith.constant 0 : index
    %c0_12 = arith.constant 0 : index
    %13 = vector.load %arg9[%c0_11, %c0_12] : memref<256x256xf32, #tpu.memory_space<vmem>>, vector<256x256xf32>
    tpu.vector_store %arg9[%c0_11, %c0_12], %12 {strides = array<i32>} : memref<256x256xf32, #tpu.memory_space<vmem>>, vector<256x256xf32>,
    %c1_i32 = arith.constant 1 : i32
    %14 = arith.cmpi eq, %arg1, %c1_i32 : i32
    %15 = arith.extui %14 : i1 to i32
    %c0_i32_13 = arith.constant 0 : i32
    %16 = arith.cmpi ne, %15, %c0_i32_13 : i32
    scf.if %16 {
      %c0_14 = arith.constant 0 : index
      %c0_15 = arith.constant 0 : index
      %17 = vector.load %arg9[%c0_14, %c0_15] : memref<256x256xf32, #tpu.memory_space<vmem>>, vector<256x256xf32>
      %18 = vector.extract_strided_slice %17 {offsets = [0, 0], sizes = [256, 128], strides = [1, 1]} : vector<256x256xf32> to vector<256x128xf32>
      %19 = math.tanh %18 : vector<256x128xf32>
      %20 = vector.extract_strided_slice %17 {offsets = [0, 128], sizes = [256, 128], strides = [1, 1]} : vector<256x256xf32> to vector<256x128xf32>
      %cst_16 = arith.constant 0.000000e+00 : f32
      %21 = vector.broadcast %cst_16 : f32 to vector<256x128xf32>
      %22 = arith.subf %21, %20 : vector<256x128xf32>
      %23 = math.exp %22 : vector<256x128xf32>
      %cst_17 = arith.constant 1.000000e+00 : f32
      %24 = vector.broadcast %cst_17 : f32 to vector<256x128xf32>
      %25 = arith.addf %24, %23 : vector<256x128xf32>
      %cst_18 = arith.constant 1.000000e+00 : f32
      %26 = vector.broadcast %cst_18 : f32 to vector<256x128xf32>
      %27 = arith.divf %26, %25 : vector<256x128xf32>
      %28 = arith.mulf %19, %27 : vector<256x128xf32>
      %c0_19 = arith.constant 0 : index
      %c0_20 = arith.constant 0 : index
      %29 = vector.load %arg6[%c0_19, %c0_20] : memref<128x128xf32, #tpu.memory_space<vmem>>, vector<128x128xf32>
      %cst_21 = arith.constant dense<0.000000e+00> : vector<256x128xf32>
      %30 = tpu.matmul %28, %29, %cst_21 {dimension_numbers = #tpu.dot_dimension_numbers<[1], [0], [0], [1], [0, 0, 1, 1], [], []>} : vector<256x128xf32>, vector<128x128xf32>, vector<256x128xf32> -> vector<256x128xf32>
      %c0_22 = arith.constant 0 : index
      %c0_23 = arith.constant 0 : index
      %31 = vector.load %arg7[%c0_22, %c0_23] : memref<1x128xf32, #tpu.memory_space<vmem>>, vector<1x128xf32>
      %32 = vector.broadcast %31 : vector<1x128xf32> to vector<256x128xf32>
      %33 = arith.addf %30, %32 : vector<256x128xf32>
      %c0_24 = arith.constant 0 : index
      %c0_25 = arith.constant 0 : index
      %34 = vector.load %arg8[%c0_24, %c0_25] : memref<256x128xf32, #tpu.memory_space<vmem>>, vector<256x128xf32>
      tpu.vector_store %arg8[%c0_24, %c0_25], %33 {strides = array<i32>} : memref<256x128xf32, #tpu.memory_space<vmem>>, vector<256x128xf32>,
    } else {
    }
    return
  }
  func.func @transform_0(%arg0: i32, %arg1: i32) -> (i32, i32) {
    %c0_i32 = arith.constant 0 : i32
    %c0_i32_0 = arith.constant 0 : i32
    return %arg1, %c0_i32 : i32, i32
  }
  func.func @transform_1(%arg0: i32, %arg1: i32) -> (i32, i32) {
    %c0_i32 = arith.constant 0 : i32
    return %arg0, %arg1 : i32, i32
  }
  func.func @transform_2(%arg0: i32, %arg1: i32) -> (i32, i32) {
    %c0_i32 = arith.constant 0 : i32
    %c0_i32_0 = arith.constant 0 : i32
    %c0_i32_1 = arith.constant 0 : i32
    return %c0_i32, %c0_i32_0 : i32, i32
  }
  func.func @transform_3(%arg0: i32, %arg1: i32) -> (i32, i32) {
    %c0_i32 = arith.constant 0 : i32
    %c0_i32_0 = arith.constant 0 : i32
    %c0_i32_1 = arith.constant 0 : i32
    return %c0_i32, %c0_i32_0 : i32, i32
  }
  func.func @transform_4(%arg0: i32, %arg1: i32) -> (i32, i32) {
    %c0_i32 = arith.constant 0 : i32
    %c0_i32_0 = arith.constant 0 : i32
    %c0_i32_1 = arith.constant 0 : i32
    return %c0_i32, %c0_i32_0 : i32, i32
  }
  func.func @transform_5(%arg0: i32, %arg1: i32) -> (i32, i32) {
    %c0_i32 = arith.constant 0 : i32
    %c0_i32_0 = arith.constant 0 : i32
    %c0_i32_1 = arith.constant 0 : i32
    return %c0_i32, %c0_i32_0 : i32, i32
  }
  func.func @transform_6(%arg0: i32, %arg1: i32) -> (i32, i32) {
    %c0_i32 = arith.constant 0 : i32
    %c0_i32_0 = arith.constant 0 : i32
    return %arg0, %c0_i32 : i32, i32
  }
}

</mosaic_0001>

<bundles_post_ra>
// kernel: tpu_custom_call.1
= control target key start
LH: loop header
LB: loop body
LE: loop exit
PB: predicated region body
PF: predicated region fallthrough
CT: control target
= control target key end

     0   :  { %s3795_s0 = inlined_call_operand.hbm [shape: f32[512,128], index: 0, kind: input, shape index: {}]   ;;  %s3796_s1 = inlined_call_operand.hbm [shape: f32[512,512], index: 1, kind: input, shape index: {}]   ;;  %s3797_s2 = inlined_call_operand.hbm [shape: f32[128,256], index: 2, kind: input, shape index: {}]   ;;  %s3798_s3 = inlined_call_operand.vmem [shape: f32[1,256], index: 3, kind: input, shape index: {}]   ;;  %s3799_s4 = inlined_call_operand.hbm [shape: f32[128,128], index: 4, kind: input, shape index: {}]   ;;  %s3800_s5 = inlined_call_operand.vmem [shape: f32[1,128], index: 5, kind: input, shape index: {}]   ;;  %s3801_s6 = inlined_call_operand.hbm [shape: f32[512,128], index: 6, kind: output, shape index: {}]  }
   0x1   :  { %3819 = sst [smem:[#allocation28_spill]] %s3795_s0 }
   0x2   :  { %3820 = sst [smem:[#allocation29_spill]] %s3797_s2 }
   0x3   :  { %3821 = sst [smem:[#allocation30_spill]] %s3798_s3 }
   0x4   :  { %3822 = sst [smem:[#allocation31_spill]] %s3799_s4 }
   0x5   :  { %3823 = sst [smem:[#allocation32_spill]] %s3800_s5 }
   0x6   :  { %3824 = sst [smem:[#allocation33_spill]] %s3801_s6 }
   0x7   :  { %11 = vsyncpa [#allocation4], 0 }
   0x8   :  { %13 = vsyncpa [#allocation4 + $0x1], 0 }
   0x9   :  { %14 = vsyncpa [#allocation7], 0 }
   0xa   :  { %16 = vsyncpa [#allocation7 + $0x1], 0 }
   0xb   :  { %17 = vsyncpa [#allocation10], 0 }
   0xc   :  { %18 = vsyncpa [#allocation5], 0 }
   0xd   :  { %20 = vsyncpa [#allocation5 + $0x1], 0  ;;  %s3034_s21 = smov 0   ;;  %s3036_s22 = smov 0  }
   0xe   :  { %s3038_s23 = smov 0   ;;  %s3040_s24 = smov 0  }
   0xf   :  { %s3042_s25 = smov 0   ;;  %s3044_s26 = smov 0  }
  0x10   :  { %s3046_s27 = smov 0   ;;  %s3048_s28 = smov 0  }
  0x11   :  { %s3050_s29 = smov 0   ;;  %s3052_s30 = smov 0  }
  0x12   :  { %s3054_s7 = smov 0   ;;  %s3056_s8 = smov 0  }
  0x13   :  { %s3058_s9 = smov 0   ;;  %s3060_s10 = smov 0  }
  0x14 LB: > { %3825 = sst [smem:[#allocation17_spill]] %s2931_s21  ;;  %s3101_s11 = sadd.s32 4294967295, %s2983_s10   ;;  %s2983_s10 = sphi %s3060_s10, %s26_s10   ;;  %s2979_s9 = sphi %s3058_s9, %s3894_s9   ;;  %s2975_s8 = sphi %s3056_s8, %s3893_s8   ;;  %s2971_s7 = sphi %s3054_s7, %s3892_s7   ;;  %s2967_s30 = sphi %s3052_s30, %s3891_s30   ;;  %s2963_s29 = sphi %s3050_s29, %s3890_s29   ;;  %s2959_s28 = sphi %s3048_s28, %s3889_s28   ;;  %s2955_s27 = sphi %s3046_s27, %s3888_s27   ;;  %s2951_s26 = sphi %s3044_s26, %s3887_s26   ;;  %s2947_s25 = sphi %s3042_s25, %s3886_s25   ;;  %s2943_s24 = sphi %s3040_s24, %s3885_s24   ;;  %s2939_s23 = sphi %s3038_s23, %s3884_s23   ;;  %s2935_s22 = sphi %s3036_s22, %s3883_s22   ;;  %s2931_s21 = sphi %s3034_s21, %s3882_s21  }
  0x15   : > { %3826 = sst [smem:[#allocation18_spill]] %s2963_s29  ;;  %s2022_s12 = sadd.s32 4294967294, %s2983_s10  }
  0x16   : > { %3827 = sst [smem:[#allocation19_spill]] %s2967_s30  ;;  %p58_p0 = scmp.ne.s32.totalorder %s2959_s28, %s2955_s27 }
  0x17   : > { %3828 = sst [smem:[#allocation20_spill]] %s2971_s7  ;;  %p3807_p1 = scmp.eq.s32.totalorder %s3101_s11, 0 }
  0x18   : > { %p86_p3 = scmp.ne.s32.totalorder %s2947_s25, %s2943_s24  ;;  %p193_p6 = scmp.ne.s32.totalorder %s2939_s23, %s2935_s22 }
  0x19   : > { %p3111_p4 = por %p3807_p1, %p58_p0  ;;  %p194_p7 = scmp.eq.s32.totalorder %s3101_s11, 3 }
  0x1a   : > { %p3118_p5 = por %p86_p3, %p3807_p1  ;;  %p199_p8 = scmp.ne.s32.totalorder %s2935_s22, %s2931_s21 }
  0x1b   : > { %s3829_s13 = scalar_select %p3111_p4, 1, 0 }
  0x1c   : > { %s3830_s15 = scalar_select %p3118_p5, 1, 0 }
  0x1d   : > { %p200_p9 = scmp.eq.s32.totalorder %s2022_s12, 3  ;;  %p2023_p10 = scmp.ge.s32.totalorder %s2983_s10, 1 }
  0x1e   : > { %p3128_p11 = por %p194_p7, %p193_p6  ;;  %p207_p12 = scmp.lt.s32.totalorder %s2983_s10, 5 }
  0x1f   : > { %p3133_p13 = por %p200_p9, %p199_p8  ;;  %s2985_s19 = smov [#allocation8]  }
  0x20   : > { %s3831_s16 = scalar_select %p3128_p11, 1, 0 }
  0x21   : > { %s3833_s17 = scalar_select %p3133_p13, 1, 0 }
  0x22   : > { %3832 = sst [smem:[#allocation21_spill]] %s3831_s16  ;;  %p3137_p0 = pnand %p2023_p10, %p207_p12 }
  0x23   : > { %3834 = sst [smem:[#allocation22_spill]] %s3833_s17  ;;  %s219_s20 = sshll.u32 %s2985_s19, 4  ;;  %s220_s20 = int_to_ptr.vmem [resolvable:$true] %s219_s20 }
  0x24   : > { %s3835_s18 = scalar_select %p3137_p0, 1, 0 }
  0x25   : > { %p2370_p3 = pneg %p3137_p0  ;;  %s2986_s27 = smov [#allocation9]  }
  0x26   : > { %s235_s12 = sshll.u32 %s2986_s27, 4  ;;  %s3837_s2 = sld [smem:[#allocation29_spill]]  ;;  %s3149_s12 = int_to_ptr.vmem [resolvable:$true] %s235_s12 }
  0x27   : > { %p3145_p6 = pnand %p2370_p3, %p3807_p1 }
  0x29   : > { %p2711_p8 = pneg %p3145_p6 }
  0x2c   : > { %s2709_s21 = scalar_lea.hbm %s3837_s2, 4096 }
  0x2d   : > { %p2710_p7 = scmp.ne.s32.totalorder %s3837_s2, %s2709_s21  ;;  %p2716_p12 = scmp.lt.u32.totalorder %s2709_s21, %s3837_s2 }
  0x2f   : > { %p2712_p9 = pnand %p2711_p8, %p2710_p7 }
  0x31   : > { %p2713_p10 = pneg %p2712_p9 }
  0x33   : > { %p2718_p3 = pnand %p2716_p12, %p2713_p10 }
  0x35   : > { %2721 = shalt.err (!%p2718_p3)
}
  0x36   : > { %s2722_s27 = scalar_lea.vmem %s220_s20, 4096  ;;  %p2730_p11 = scmp.lt.s32.totalorder %s220_s20, %s220_s20 }
  0x37   : > { %p2723_p1 = scmp.ne.s32.totalorder %s220_s20, %s2722_s27  ;;  %p2731_p5 = scmp.lt.s32.totalorder %s2722_s27, %s2722_s27 }
  0x39   : > { %p2725_p2 = pnand %p2723_p1, %p2711_p8  ;;  %p2732_p4 = por %p2731_p5, %p2730_p11 }
  0x3b   : > { %p2726_p13 = pneg %p2725_p2 }
  0x3d   : > { %p2733_p0 = pnand %p2732_p4, %p2726_p13 }
  0x3f   : > { %2736 = shalt.err (!%p2733_p0)
}
  0x40   : > { %s3812_s6 = smov 256   ;;  %s3813_s14 = smov 16  }
  0x41   : > { %2373 = dma.hbm_to_vmem [thread:$0]  (!%p3145_p6), %s3837_s2, 4096, %s220_s20, [#allocation7], %s3812_s6, %s3812_s6, %s3813_s14  }
  0x42   : > { %s3838_s4 = sld [smem:[#allocation31_spill]] }
  0x48   : > { %s2737_s19 = scalar_lea.hbm %s3838_s4, 2048 }
  0x49   : > { %p2738_p1 = scmp.ne.s32.totalorder %s3838_s4, %s2737_s19  ;;  %p2744_p5 = scmp.lt.u32.totalorder %s2737_s19, %s3838_s4 }
  0x4b   : > { %p2740_p2 = pnand %p2738_p1, %p2711_p8 }
  0x4d   : > { %p2741_p4 = pneg %p2740_p2 }
  0x4f   : > { %p2746_p11 = pnand %p2744_p5, %p2741_p4 }
  0x51   : > { %2749 = shalt.err (!%p2746_p11)
}
  0x52   : > { %s2750_s20 = scalar_lea.vmem %s3149_s12, 2048  ;;  %p2758_p9 = scmp.lt.s32.totalorder %s3149_s12, %s3149_s12 }
  0x53   : > { %p2751_p13 = scmp.ne.s32.totalorder %s3149_s12, %s2750_s20  ;;  %p2759_p10 = scmp.lt.s32.totalorder %s2750_s20, %s2750_s20 }
  0x55   : > { %p2753_p0 = pnand %p2751_p13, %p2711_p8  ;;  %p2760_p12 = por %p2759_p10, %p2758_p9 }
  0x57   : > { %p2754_p7 = pneg %p2753_p0 }
  0x59   : > { %p2761_p3 = pnand %p2760_p12, %p2754_p7 }
  0x5b   : > { %2764 = shalt.err (!%p2761_p3)
}
  0x5c   : > { %s3814_s3 = smov 128   ;;  %s3815_s5 = smov 8  }
  0x5d   : > { %2376 = dma.hbm_to_vmem [thread:$0]  (!%p3145_p6), %s3838_s4, 2048, %s3149_s12, [#allocation10], %s3814_s3, %s3814_s3, %s3815_s5  }
  0x5e   : > { %s35_s7 = sadd.s32 1, %s2975_s8  ;;  %s38_s16 = sadd.s32 1, %s2979_s9 }
  0x5f   : > { %p36_p8 = scmp.ge.s32.totalorder %s35_s7, 2  ;;  %s45_s17 = sadd.s32 1, %s2963_s29 }
  0x60   : > { %p52_p1 = scmp.ne.s32.totalorder %s2963_s29, %s2959_s28  ;;  %p53_p2 = scmp.eq.s32.totalorder %s2983_s10, 0 }
  0x61   : > { %s3896_s7 = smov (%p36_p8, %s35_s7), 0  ;;  %s3898_s16 = smov (!%p36_p8, %s38_s16), %s2979_s9 }
  0x62   : > { %3839 = sst [smem:[#allocation23_spill]] %s3896_s7  ;;  %s42_s24 = ssub.s32 %s2975_s8, %s3896_s7 }
  0x63   : > { %p40_p6 = scmp.ge.s32.totalorder %s3898_s16, 2  ;;  %p43_p4 = scmp.eq.s32.totalorder %s42_s24, 0 }
  0x64   : > { %p3215_p5 = por %p53_p2, %p52_p1  ;;  %s73_s19 = sadd.s32 1, %s2951_s26 }
  0x65   : > { %s3900_s16 = smov (%p40_p6, %s3898_s16), 0  ;;  %p3843_p11 = scmp.ne.s32.totalorder %s2951_s26, %s2947_s25 }
  0x66   : > { %3841 = sst [smem:[#allocation24_spill]] %s3900_s16  ;;  %s68_s20 = ssub.s32 %s2979_s9, %s3900_s16 }
  0x67   : > { %s3223_s27 = scalar_select %p43_p4, %s2963_s29, %s45_s17  }
  0x68   : > { %p3230_p13 = por %p3843_p11, %p53_p2  ;;  %s70_s21 = sor.u32 %s68_s20, %s42_s24 }
  0x69   : > { %3842 = sst [smem:[#allocation25_spill]] %s3223_s27  ;;  %p181_p0 = scmp.eq.s32.totalorder %s68_s20, 0 }
  0x6a   : > { %p71_p7 = scmp.eq.s32.totalorder %s70_s21, 0  ;;  %p2390_p9 = scmp.lt.s32.totalorder %s2983_s10, 4 }
  0x6b   : > { %s3845_s6 = sadd.s32 1, %s2939_s23  ;;  %s252_s5 = sand.u32 1, %s2963_s29  }
  0x6c   : > { %s3238_s14 = scalar_select %p181_p0, %s2939_s23, %s3845_s6  }
  0x6d   : > { %s3241_s3 = scalar_select %p71_p7, %s2951_s26, %s73_s19  }
  0x6e   : > { %3846 = sst [smem:[#allocation26_spill]] %s3238_s14  ;;  %s2049_s17 = sshll.u32 %s2975_s8, 12 }
  0x6f   : > { %3847 = sst [smem:[#allocation27_spill]] %s3241_s3  ;;  %s2027_s2 = sshll.u32 %s252_s5, 8 }
  0x70   : > { %s3848_s0 = sld [smem:[#allocation28_spill]]  ;;  %s256_s24 = scalar_lea.vmem [#allocation3], %s2027_s2 }
  0x71   : > { %s263_s20 = sshll.u32 %s256_s24, 4  ;;  %p3252_p10 = pnand %p2390_p9, %p3215_p5  ;;  %s3256_s20 = int_to_ptr.vmem [resolvable:$true] %s263_s20 }
  0x72   : > { %s2032_s19 = sshll.u32 %s2975_s8, 1  ;;  %p3261_p12 = pnand %p2390_p9, %p3230_p13 }
  0x73   : > { %s3265_s16 = scalar_lea.sflag [#allocation4], %s252_s5  ;;  %p2767_p8 = pneg %p3252_p10 }
  0x76   : > { %s3248_s7 = scalar_lea.hbm %s3848_s0, %s2049_s17  ;;  %s2770_s17 = scalar_lea.hbm %s3848_s0, 8192 }
  0x77   : > { %s2765_s2 = scalar_lea.hbm %s3248_s7, 4096  ;;  %p2771_p6 = scmp.lt.u32.totalorder %s3248_s7, %s3848_s0 }
  0x78   : > { %p2766_p3 = scmp.ne.s32.totalorder %s3248_s7, %s2765_s2  ;;  %p2772_p4 = scmp.lt.u32.totalorder %s2770_s17, %s2765_s2 }
  0x79   : > { %p2774_p11 = scmp.lt.u32.totalorder %s2765_s2, %s3248_s7 }
  0x7a   : > { %p2768_p1 = pnand %p2767_p8, %p2766_p3  ;;  %p2773_p5 = por %p2772_p4, %p2771_p6 }
  0x7c   : > { %p2769_p2 = pneg %p2768_p1  ;;  %p2775_p13 = por %p2774_p11, %p2773_p5 }
  0x7e   : > { %p2776_p0 = pnand %p2775_p13, %p2769_p2 }
  0x80   : > { %2779 = shalt.err (!%p2776_p0)
}
  0x81   : > { %s2780_s5 = scalar_lea.vmem %s3256_s20, 4096  ;;  %s2991_s12 = smov [#allocation3]  }
  0x82   : > { %p2781_p7 = scmp.ne.s32.totalorder %s3256_s20, %s2780_s5  ;;  %s2785_s21 = sshll.u32 %s2991_s12, 4  ;;  %s2786_s21 = int_to_ptr.vmem [resolvable:$false] %s2785_s21 }
  0x83   : > { %s2787_s24 = scalar_lea.vmem %s2786_s21, 8192  ;;  %p2788_p1 = scmp.lt.s32.totalorder %s3256_s20, %s2786_s21 }
  0x84   : > { %p2783_p9 = pnand %p2781_p7, %p2767_p8  ;;  %p2789_p6 = scmp.lt.s32.totalorder %s2787_s24, %s2780_s5 }
  0x86   : > { %p2784_p3 = pneg %p2783_p9  ;;  %p2790_p4 = por %p2789_p6, %p2788_p1 }
  0x88   : > { %p2791_p5 = pnand %p2790_p4, %p2784_p3 }
  0x8a   : > { %2794 = shalt.err (!%p2791_p5)
}
  0x8b   : > { %s3851_s2 = smov 8   ;;  %s3852_s17 = smov 128  }
  0x8c   : > { %2380 = dma.hbm_to_vmem [thread:$0]  (!%p3252_p10), %s3248_s7, 4096, %s3256_s20, %s3265_s16, %s3852_s17, %s3852_s17, %s3851_s2  }
  0x8d   : > { %s273_s30 = sand.u32 1, %s2983_s10   ;;  %s275_s5 = sand.u32 1, %s2951_s26  }
  0x8e   : > { %s2030_s12 = sshll.u32 %s275_s5, 9  ;;  %s2050_s21 = sshll.u32 %s2979_s9, 7 }
  0x8f   : > { %s284_s24 = sadd.s32 %s2050_s21, %s2032_s19  ;;  %s277_s0 = scalar_lea.vmem [#allocation6], %s2030_s12 }
  0x90   : > { %s2034_s6 = sshll.u32 %s284_s24, 7  ;;  %s287_s27 = sshll.u32 %s277_s0, 4  ;;  %s3306_s27 = int_to_ptr.vmem [resolvable:$true] %s287_s27 }
  0x91   : > { %s3304_s14 = scalar_lea.hbm %s3796_s1, %s2034_s6  ;;  %s3308_s7 = scalar_lea.sflag [#allocation7], %s273_s30 }
  0x92   : > { %s2795_s20 = scalar_lea.hbm %s3304_s14, 8192  ;;  %p2797_p8 = pneg %p3261_p12 }
  0x93   : > { %p2796_p10 = scmp.ne.s32.totalorder %s3304_s14, %s2795_s20  ;;  %s2800_s3 = scalar_lea.hbm %s3796_s1, 32768 }
  0x94   : > { %p2801_p13 = scmp.lt.u32.totalorder %s3304_s14, %s3796_s1  ;;  %p2802_p0 = scmp.lt.u32.totalorder %s2800_s3, %s2795_s20 }
  0x95   : > { %p2798_p2 = pnand %p2797_p8, %p2796_p10  ;;  %p2804_p9 = scmp.lt.u32.totalorder %s2795_s20, %s3304_s14 }
  0x96   : > { %p2803_p7 = por %p2802_p0, %p2801_p13 }
  0x97   : > { %p2799_p11 = pneg %p2798_p2 }
  0x98   : > { %p2805_p3 = por %p2804_p9, %p2803_p7 }
  0x9a   : > { %p2806_p1 = pnand %p2805_p3, %p2799_p11 }
  0x9c   : > { %2809 = shalt.err (!%p2806_p1)
}
  0x9d   : > { %s2810_s2 = scalar_lea.vmem %s3306_s27, 8192  ;;  %s2992_s17 = smov [#allocation6]  }
  0x9e   : > { %p2811_p6 = scmp.ne.s32.totalorder %s3306_s27, %s2810_s2  ;;  %s2815_s30 = sshll.u32 %s2992_s17, 4  ;;  %s2816_s30 = int_to_ptr.vmem [resolvable:$false] %s2815_s30 }
  0x9f   : > { %s2817_s5 = scalar_lea.vmem %s2816_s30, 16384  ;;  %p2818_p10 = scmp.lt.s32.totalorder %s3306_s27, %s2816_s30 }
  0xa0   : > { %p2813_p4 = pnand %p2811_p6, %p2797_p8  ;;  %p2819_p2 = scmp.lt.s32.totalorder %s2817_s5, %s2810_s2 }
  0xa2   : > { %p2814_p5 = pneg %p2813_p4  ;;  %p2820_p13 = por %p2819_p2, %p2818_p10 }
  0xa4   : > { %p2821_p0 = pnand %p2820_p13, %p2814_p5 }
  0xa6   : > { %2824 = shalt.err (!%p2821_p0)
}
  0xa7   : > { %s2993_s12 = smov 512   ;;  %s3853_s21 = smov 16  }
  0xa8   : > { %s3854_s24 = smov 256   ;;  %p3855_p8 = scmp.ne.s32.totalorder %s3835_s18, 0 }
  0xa9   : > { %2383 = dma.hbm_to_vmem [thread:$0]  (!%p3261_p12), %s3304_s14, 8192, %s3306_s27, %s3308_s7, %s2993_s12, %s3854_s24, %s3853_s21  }
  0xaa   : > { %299 = sbr.rel (%p3855_p8) target bundleno = 1276 (0x4fc), region = 44  ;;  %s301_s6 = sand.u32 (!%p3855_p8), 1, %s2959_s28  }
  0xab   : > { %s2036_s20 = sshll.u32 (!%p3855_p8), %s301_s6, 8  ;;  %s302_s0 = scalar_lea.sflag (!%p3855_p8), [#allocation4], %s301_s6 }
  0xac   : > { %s3341_s29 = scalar_lea.vmem (!%p3855_p8), [#allocation3], %s2036_s20  ;;  %p3856_p11 = scmp.ne.s32.totalorder (!%p3855_p8), %s3829_s13, 0 }
  0xb1   : > { %2910 = dma.done.wait (%p3856_p11), %s302_s0, 4096  }
  0xb2   : > { %2912 = vsyncadd (%p3856_p11), %s302_s0, 4294963200  ;;  %s310_s4 = sand.u32 1, %s3101_s11   ;;  %s312_s14 = sand.u32 1, %s2947_s25  }
  0xb3   : > { %s2037_s27 = sshll.u32 %s312_s14, 9  ;;  %s311_s18 = scalar_lea.sflag [#allocation7], %s310_s4 }
  0xb4   : > { %s3349_s7 = scalar_lea.vmem [#allocation6], %s2037_s27  ;;  %p3857_p12 = scmp.ne.s32.totalorder %s3830_s15, 0 }
  0xb6   : > { %2914 = dma.done.wait (%p3857_p12), %s311_s18, 8192  }
  0xb7   : > { %2916 = vsyncadd (%p3857_p12), %s311_s18, 4294959104  ;;  %p3858_p7 = scmp.eq.s32.totalorder %s3101_s11, 0 }
  0xb9   : > { %2918 = dma.done.wait (%p3858_p7), [#allocation7], 4096   ;;  %p3859_p9 = pmov %p3858_p7 }
  0xba   : > { %p3860_p3 = pmov %p3858_p7 }
  0xbb   : > { %2920 = vsyncadd (%p3859_p9), [#allocation7], 4294963200 }
  0xbc   : > { %2922 = dma.done.wait (%p3860_p3), [#allocation10], 2048   ;;  %p3861_p1 = pmov %p3860_p3 }
  0xbd   : > { %s353_s13 = sand.u32 1, %s2935_s22   ;;  %s3862_s15 = sld [smem:[#allocation19_spill]] }
  0xbe   : > { %2924 = vsyncadd (%p3861_p1), [#allocation10], 4294965248  ;;  %s2040_s3 = sshll.u32 %s353_s13, 8 }
  0xbf   : > { %s3366_s19 = scalar_lea.vmem [#allocation11], %s2040_s3 }
  0xc3   : > { %p2041_p6 = scmp.ne.s32.totalorder %s3862_s15, 0 }
  0xc4   : > { %v2994_v0 = vmov (!%p2041_p6), 0.0  }
  0xc5   : > { %363 = sbr.rel (%p2041_p6) target bundleno = 229 (0xe5), region = 64  ;;  %364 = vst [vmem:[#allocation2] sm:$0xff] (!%p2041_p6), %v2994_v0  ;;  %365 = vst [vmem:[#allocation2 + $0x8] sm:$0xff] (!%p2041_p6), %v2994_v0 }
  0xc6   : > { %366 = vst [vmem:[#allocation2 + $0x10] sm:$0xff] (!%p2041_p6), %v2994_v0  ;;  %367 = vst [vmem:[#allocation2 + $0x18] sm:$0xff] (!%p2041_p6), %v2994_v0 }
  0xc7   : > { %368 = vst [vmem:[#allocation2 + $0x20] sm:$0xff] (!%p2041_p6), %v2994_v0  ;;  %369 = vst [vmem:[#allocation2 + $0x28] sm:$0xff] (!%p2041_p6), %v2994_v0 }
  0xc8   : > { %370 = vst [vmem:[#allocation2 + $0x30] sm:$0xff] (!%p2041_p6), %v2994_v0  ;;  %371 = vst [vmem:[#allocation2 + $0x38] sm:$0xff] (!%p2041_p6), %v2994_v0 }
  0xc9   : > { %372 = vst [vmem:[#allocation2 + $0x40] sm:$0xff] (!%p2041_p6), %v2994_v0  ;;  %373 = vst [vmem:[#allocation2 + $0x48] sm:$0xff] (!%p2041_p6), %v2994_v0 }
  0xca   : > { %374 = vst [vmem:[#allocation2 + $0x50] sm:$0xff] (!%p2041_p6), %v2994_v0  ;;  %375 = vst [vmem:[#allocation2 + $0x58] sm:$0xff] (!%p2041_p6), %v2994_v0 }
  0xcb   : > { %376 = vst [vmem:[#allocation2 + $0x60] sm:$0xff] (!%p2041_p6), %v2994_v0  ;;  %377 = vst [vmem:[#allocation2 + $0x68] sm:$0xff] (!%p2041_p6), %v2994_v0 }
  0xcc   : > { %378 = vst [vmem:[#allocation2 + $0x70] sm:$0xff] %v2994_v0  ;;  %379 = vst [vmem:[#allocation2 + $0x78] sm:$0xff] %v2994_v0 }
  0xcd   : > { %380 = vst [vmem:[#allocation2 + $0x80] sm:$0xff] %v2994_v0  ;;  %381 = vst [vmem:[#allocation2 + $0x88] sm:$0xff] %v2994_v0 }
  0xce   : > { %382 = vst [vmem:[#allocation2 + $0x90] sm:$0xff] %v2994_v0  ;;  %383 = vst [vmem:[#allocation2 + $0x98] sm:$0xff] %v2994_v0 }
  0xcf   : > { %384 = vst [vmem:[#allocation2 + $0xa0] sm:$0xff] %v2994_v0  ;;  %385 = vst [vmem:[#allocation2 + $0xa8] sm:$0xff] %v2994_v0 }
  0xd0   : > { %386 = vst [vmem:[#allocation2 + $0xb0] sm:$0xff] %v2994_v0  ;;  %387 = vst [vmem:[#allocation2 + $0xb8] sm:$0xff] %v2994_v0 }
  0xd1   : > { %388 = vst [vmem:[#allocation2 + $0xc0] sm:$0xff] %v2994_v0  ;;  %389 = vst [vmem:[#allocation2 + $0xc8] sm:$0xff] %v2994_v0 }
  0xd2   : > { %390 = vst [vmem:[#allocation2 + $0xd0] sm:$0xff] %v2994_v0  ;;  %391 = vst [vmem:[#allocation2 + $0xd8] sm:$0xff] %v2994_v0 }
  0xd3   : > { %392 = vst [vmem:[#allocation2 + $0xe0] sm:$0xff] %v2994_v0  ;;  %393 = vst [vmem:[#allocation2 + $0xe8] sm:$0xff] %v2994_v0 }
  0xd4   : > { %394 = vst [vmem:[#allocation2 + $0xf0] sm:$0xff] %v2994_v0  ;;  %395 = vst [vmem:[#allocation2 + $0xf8] sm:$0xff] %v2994_v0 }
  0xd5   : > { %396 = vst [vmem:[#allocation2 + $0x100] sm:$0xff] %v2994_v0  ;;  %397 = vst [vmem:[#allocation2 + $0x108] sm:$0xff] %v2994_v0 }
  0xd6   : > { %398 = vst [vmem:[#allocation2 + $0x110] sm:$0xff] %v2994_v0  ;;  %399 = vst [vmem:[#allocation2 + $0x118] sm:$0xff] %v2994_v0 }
  0xd7   : > { %400 = vst [vmem:[#allocation2 + $0x120] sm:$0xff] %v2994_v0  ;;  %401 = vst [vmem:[#allocation2 + $0x128] sm:$0xff] %v2994_v0 }
  0xd8   : > { %402 = vst [vmem:[#allocation2 + $0x130] sm:$0xff] %v2994_v0  ;;  %403 = vst [vmem:[#allocation2 + $0x138] sm:$0xff] %v2994_v0 }
  0xd9   : > { %404 = vst [vmem:[#allocation2 + $0x140] sm:$0xff] %v2994_v0  ;;  %405 = vst [vmem:[#allocation2 + $0x148] sm:$0xff] %v2994_v0 }
  0xda   : > { %406 = vst [vmem:[#allocation2 + $0x150] sm:$0xff] %v2994_v0  ;;  %407 = vst [vmem:[#allocation2 + $0x158] sm:$0xff] %v2994_v0 }
  0xdb   : > { %408 = vst [vmem:[#allocation2 + $0x160] sm:$0xff] %v2994_v0  ;;  %409 = vst [vmem:[#allocation2 + $0x168] sm:$0xff] %v2994_v0 }
  0xdc   : > { %410 = vst [vmem:[#allocation2 + $0x170] sm:$0xff] %v2994_v0  ;;  %411 = vst [vmem:[#allocation2 + $0x178] sm:$0xff] %v2994_v0 }
  0xdd   : > { %412 = vst [vmem:[#allocation2 + $0x180] sm:$0xff] %v2994_v0  ;;  %413 = vst [vmem:[#allocation2 + $0x188] sm:$0xff] %v2994_v0 }
  0xde   : > { %414 = vst [vmem:[#allocation2 + $0x190] sm:$0xff] %v2994_v0  ;;  %415 = vst [vmem:[#allocation2 + $0x198] sm:$0xff] %v2994_v0 }
  0xdf   : > { %416 = vst [vmem:[#allocation2 + $0x1a0] sm:$0xff] %v2994_v0  ;;  %417 = vst [vmem:[#allocation2 + $0x1a8] sm:$0xff] %v2994_v0 }
  0xe0   : > { %418 = vst [vmem:[#allocation2 + $0x1b0] sm:$0xff] %v2994_v0  ;;  %419 = vst [vmem:[#allocation2 + $0x1b8] sm:$0xff] %v2994_v0 }
  0xe1   : > { %420 = vst [vmem:[#allocation2 + $0x1c0] sm:$0xff] %v2994_v0  ;;  %421 = vst [vmem:[#allocation2 + $0x1c8] sm:$0xff] %v2994_v0 }
  0xe2   : > { %422 = vst [vmem:[#allocation2 + $0x1d0] sm:$0xff] %v2994_v0  ;;  %423 = vst [vmem:[#allocation2 + $0x1d8] sm:$0xff] %v2994_v0 }
  0xe3   : > { %424 = vst [vmem:[#allocation2 + $0x1e0] sm:$0xff] %v2994_v0  ;;  %425 = vst [vmem:[#allocation2 + $0x1e8] sm:$0xff] %v2994_v0 }
  0xe4   : > { %426 = vst [vmem:[#allocation2 + $0x1f0] sm:$0xff] %v2994_v0  ;;  %427 = vst [vmem:[#allocation2 + $0x1f8] sm:$0xff] %v2994_v0 }
  0xe5 PF: > { %v461_v1 = vld [vmem:[#allocation8 + $0x8] sm:$0xff]  ;;  %v463_v2 = vld [vmem:[#allocation8 + $0x18] sm:$0xff]  ;;  %v460_v3 = vld [vmem:[#allocation8] sm:$0xff]  ;;  %v2995_v8 = vmov 0.0   ;;  %s3863_s2 = sld [smem:[#allocation30_spill]]  ;;  %s3864_s17 = sld [smem:[#allocation19_spill]] }
  0xe6   : > { %v2180_v4 = vpack.c.bf16 %v463_v2, %v461_v1  ;;  %v462_v5 = vld [vmem:[#allocation8 + $0x10] sm:$0xff]  ;;  %v465_v6 = vld [vmem:[#allocation8 + $0x28] sm:$0xff]  ;;  %v467_v7 = vld [vmem:[#allocation8 + $0x38] sm:$0xff]  ;;  %568 = vmatprep.mubr.f32.mxu0 %v2995_v8 }
  0xe7   : > { %v2182_v9 = vpack.c.bf16 %v462_v5, %v460_v3  ;;  %v2184_v10 = vpack.c.bf16 %v467_v7, %v465_v6  ;;  %v464_v11 = vld [vmem:[#allocation8 + $0x20] sm:$0xff]  ;;  %v466_v12 = vld [vmem:[#allocation8 + $0x30] sm:$0xff]  ;;  %v469_v13 = vld [vmem:[#allocation8 + $0x48] sm:$0xff] }
  0xe8   : > { %2181 = vmatprep.subr.bf16.mxu0 %v2180_v4  ;;  %v471_v14 = vld [vmem:[#allocation8 + $0x58] sm:$0xff]  ;;  %v2186_v15 = vpack.c.bf16 %v466_v12, %v464_v11  ;;  %v468_v17 = vld [vmem:[#allocation8 + $0x40] sm:$0xff]  ;;  %v470_v18 = vld [vmem:[#allocation8 + $0x50] sm:$0xff] }
  0xe9   : > { %2183 = vmatpush1.bf16.msra.mxu0 %v2182_v9  ;;  %v2188_v16 = vpack.c.bf16 %v471_v14, %v469_v13  ;;  %v473_v19 = vld [vmem:[#allocation8 + $0x68] sm:$0xff]  ;;  %v475_v20 = vld [vmem:[#allocation8 + $0x78] sm:$0xff]  ;;  %v2190_v21 = vpack.c.bf16 %v470_v18, %v468_v17  ;;  %v472_v23 = vld [vmem:[#allocation8 + $0x60] sm:$0xff] }
  0xea   : > { %2185 = vmatprep.subr.bf16.mxu0 %v2184_v10  ;;  %v2192_v22 = vpack.c.bf16 %v475_v20, %v473_v19  ;;  %v474_v24 = vld [vmem:[#allocation8 + $0x70] sm:$0xff]  ;;  %v477_v25 = vld [vmem:[#allocation8 + $0x88] sm:$0xff]  ;;  %v479_v26 = vld [vmem:[#allocation8 + $0x98] sm:$0xff]  ;;  %v494_v19 = vlaneseq }
  0xeb   : > { %v2194_v27 = vpack.c.bf16 %v474_v24, %v472_v23  ;;  %v2196_v28 = vpack.c.bf16 %v479_v26, %v477_v25  ;;  %v476_v29 = vld [vmem:[#allocation8 + $0x80] sm:$0xff]  ;;  %v478_v30 = vld [vmem:[#allocation8 + $0x90] sm:$0xff]  ;;  %v481_v31 = vld [vmem:[#allocation8 + $0xa8] sm:$0xff]  ;;  %p2042_p4 = scmp.ne.s32.totalorder %s3864_s17, 1 }
  0xec   : > { %v483_v32 = vld [vmem:[#allocation8 + $0xb8] sm:$0xff]  ;;  %v2198_v33 = vpack.c.bf16 %v478_v30, %v476_v29  ;;  %v480_v35 = vld [vmem:[#allocation8 + $0xa0] sm:$0xff]  ;;  %v482_v36 = vld [vmem:[#allocation8 + $0xb0] sm:$0xff]  ;;  %v495_v20 = vshrl.u32 %v494_v19, 7  ;;  %s3865_s12 = sld [smem:[#allocation32_spill]] (!%p2042_p4) }
  0xed   : > { %2187 = vmatpush1.bf16.msra.mxu0 %v2186_v15  ;;  %v2200_v34 = vpack.c.bf16 %v483_v32, %v481_v31  ;;  %v485_v37 = vld [vmem:[#allocation8 + $0xc8] sm:$0xff]  ;;  %v487_v38 = vld [vmem:[#allocation8 + $0xd8] sm:$0xff]  ;;  %v2202_v39 = vpack.c.bf16 %v482_v36, %v480_v35  ;;  %v484_v41 = vld [vmem:[#allocation8 + $0xc0] sm:$0xff] }
  0xee   : > { %2189 = vmatprep.subr.bf16.mxu0 %v2188_v16  ;;  %v2204_v40 = vpack.c.bf16 %v487_v38, %v485_v37  ;;  %v486_v42 = vld [vmem:[#allocation8 + $0xd0] sm:$0xff]  ;;  %v489_v43 = vld [vmem:[#allocation8 + $0xe8] sm:$0xff]  ;;  %v491_v44 = vld [vmem:[#allocation8 + $0xf8] sm:$0xff]  ;;  %v500_v23 = vsub.s32 1, %v495_v20 }
  0xef   : > { %v2206_v45 = vpack.c.bf16 %v486_v42, %v484_v41  ;;  %v2208_v46 = vpack.c.bf16 %v491_v44, %v489_v43  ;;  %v488_v47 = vld [vmem:[#allocation8 + $0xe0] sm:$0xff]  ;;  %v490_v48 = vld [vmem:[#allocation8 + $0xf0] sm:$0xff]  ;;  %v429_v51 = vld [vmem:[%s3341_s29 + $0x8] sm:$0xff] }
  0xf0   : > { %v2210_v49 = vpack.c.bf16 %v490_v48, %v488_v47  ;;  %v428_v50 = vld [vmem:[%s3341_s29] sm:$0xff]  ;;  %v430_v52 = vld [vmem:[%s3341_s29 + $0x10] sm:$0xff]  ;;  %v431_v53 = vld [vmem:[%s3341_s29 + $0x18] sm:$0xff] }
  0xf1   : > { %2191 = vmatpush1.bf16.msra.mxu0 %v2190_v21  ;;  %v432_v54 = vld [vmem:[%s3341_s29 + $0x20] sm:$0xff]  ;;  %v433_v55 = vld [vmem:[%s3341_s29 + $0x28] sm:$0xff]  ;;  %v434_v56 = vld [vmem:[%s3341_s29 + $0x30] sm:$0xff]  ;;  %v496_v21 = vsub.s32 0, %v495_v20 }
  0xf2   : > { %2193 = vmatprep.subr.bf16.mxu0 %v2192_v22  ;;  %v435_v57 = vld [vmem:[%s3341_s29 + $0x38] sm:$0xff]  ;;  %v436_v58 = vld [vmem:[%s3341_s29 + $0x40] sm:$0xff]  ;;  %v437_v59 = vld [vmem:[%s3341_s29 + $0x48] sm:$0xff] }
  0xf3   : > { %v438_v60 = vld [vmem:[%s3341_s29 + $0x50] sm:$0xff]  ;;  %v439_v61 = vld [vmem:[%s3341_s29 + $0x58] sm:$0xff]  ;;  %v440_v62 = vld [vmem:[%s3341_s29 + $0x60] sm:$0xff] }
  0xf4   : > { %v441_v63 = vld [vmem:[%s3341_s29 + $0x68] sm:$0xff]  ;;  %v442_v0 = vld [vmem:[%s3341_s29 + $0x70] sm:$0xff]  ;;  %v443_v1 = vld [vmem:[%s3341_s29 + $0x78] sm:$0xff] }
  0xf5   : > { %2195 = vmatpush1.bf16.msra.mxu0 %v2194_v27  ;;  %v444_v2 = vld [vmem:[%s3341_s29 + $0x80] sm:$0xff]  ;;  %v445_v3 = vld [vmem:[%s3341_s29 + $0x88] sm:$0xff]  ;;  %v446_v4 = vld [vmem:[%s3341_s29 + $0x90] sm:$0xff] }
  0xf6   : > { %2197 = vmatprep.subr.bf16.mxu0 %v2196_v28  ;;  %v447_v5 = vld [vmem:[%s3341_s29 + $0x98] sm:$0xff]  ;;  %v448_v6 = vld [vmem:[%s3341_s29 + $0xa0] sm:$0xff]  ;;  %v449_v7 = vld [vmem:[%s3341_s29 + $0xa8] sm:$0xff] }
  0xf7   : > { %v450_v9 = vld [vmem:[%s3341_s29 + $0xb0] sm:$0xff]  ;;  %v451_v10 = vld [vmem:[%s3341_s29 + $0xb8] sm:$0xff]  ;;  %v452_v11 = vld [vmem:[%s3341_s29 + $0xc0] sm:$0xff] }
  0xf8   : > { %v453_v12 = vld [vmem:[%s3341_s29 + $0xc8] sm:$0xff]  ;;  %v454_v13 = vld [vmem:[%s3341_s29 + $0xd0] sm:$0xff]  ;;  %v455_v14 = vld [vmem:[%s3341_s29 + $0xd8] sm:$0xff] }
  0xf9   : > { %2199 = vmatpush1.bf16.msra.mxu0 %v2198_v33  ;;  %v456_v15 = vld [vmem:[%s3341_s29 + $0xe0] sm:$0xff]  ;;  %v457_v16 = vld [vmem:[%s3341_s29 + $0xe8] sm:$0xff]  ;;  %v458_v17 = vld [vmem:[%s3341_s29 + $0xf0] sm:$0xff] }
  0xfa   : > { %2201 = vmatprep.subr.bf16.mxu0 %v2200_v34  ;;  %v459_v18 = vld [vmem:[%s3341_s29 + $0xf8] sm:$0xff]  ;;  %v492_v22 = vld [vmem:[%s3863_s2] sm:$0x3]  ;;  %v834_v28 = vld [vmem:[%s3349_s7 + $0x48] sm:$0xff] }
  0xfb   : > { %v3500_v25 = vrot.slane %v492_v22, %v496_v21  ;;  %v3502_v27 = vrot.slane %v492_v22, %v500_v23  ;;  %977 = vmatprep.mubr.f32.mxu1 %v834_v28 }
  0xfd   : > { %2203 = vmatpush1.bf16.msra.mxu0 %v2202_v39 }
  0xfe   : > { %2205 = vmatprep.subr.bf16.mxu0 %v2204_v40 }
 0x101   : > { %2207 = vmatpush1.bf16.msra.mxu0 %v2206_v45 }
 0x102   : > { %2209 = vmatprep.subr.bf16.mxu0 %v2208_v46 }
 0x105   : > { %2211 = vmatpush1.bf16.msra.mxu0 %v2210_v49 }
 0x108   : > { %569 = vmatmul.mubr.f32.vlgmr.msra.gmra.mrb[0].mxu0 %v428_v50 }
 0x109   : > { %574 = vmatprep.mubr.f32.mxu0 %v2995_v8 }
 0x10c   : > { %575 = vmatmul.mubr.f32.gmra.mrb[2].mxu0 %v429_v51 }
 0x10d   : > { %580 = vmatprep.mubr.f32.mxu0 %v2995_v8 }
 0x110   : > { %581 = vmatmul.mubr.f32.gmra.mrb[4].mxu0 %v430_v52 }
 0x111   : > { %586 = vmatprep.mubr.f32.mxu0 %v2995_v8 }
 0x114   : > { %587 = vmatmul.mubr.f32.gmra.mrb[6].mxu0 %v431_v53 }
 0x115   : > { %592 = vmatprep.mubr.f32.mxu0 %v2995_v8 }
 0x118   : > { %593 = vmatmul.mubr.f32.gmra.mrb[8].mxu0 %v432_v54 }
 0x119   : > { %598 = vmatprep.mubr.f32.mxu0 %v2995_v8 }
 0x11c   : > { %599 = vmatmul.mubr.f32.gmra.mrb[10].mxu0 %v433_v55 }
 0x11d   : > { %604 = vmatprep.mubr.f32.mxu0 %v2995_v8 }
 0x120   : > { %605 = vmatmul.mubr.f32.gmra.mrb[12].mxu0 %v434_v56 }
 0x121   : > { %610 = vmatprep.mubr.f32.mxu0 %v2995_v8 }
 0x124   : > { %611 = vmatmul.mubr.f32.gmra.mrb[14].mxu0 %v435_v57 }
 0x125   : > { %616 = vmatprep.mubr.f32.mxu0 %v2995_v8 }
 0x128   : > { %617 = vmatmul.mubr.f32.gmra.mrb[16].mxu0 %v436_v58 }
 0x129   : > { %622 = vmatprep.mubr.f32.mxu0 %v2995_v8 }
 0x12c   : > { %623 = vmatmul.mubr.f32.gmra.mrb[18].mxu0 %v437_v59 }
 0x12d   : > { %628 = vmatprep.mubr.f32.mxu0 %v2995_v8 }
 0x130   : > { %629 = vmatmul.mubr.f32.gmra.mrb[20].mxu0 %v438_v60 }
 0x131   : > { %634 = vmatprep.mubr.f32.mxu0 %v2995_v8 }
 0x134   : > { %635 = vmatmul.mubr.f32.gmra.mrb[22].mxu0 %v439_v61 }
 0x135   : > { %640 = vmatprep.mubr.f32.mxu0 %v2995_v8 }
 0x138   : > { %641 = vmatmul.mubr.f32.gmra.mrb[24].mxu0 %v440_v62 }
 0x139   : > { %646 = vmatprep.mubr.f32.mxu0 %v2995_v8 }
 0x13c   : > { %647 = vmatmul.mubr.f32.gmra.mrb[26].mxu0 %v441_v63 }
 0x13d   : > { %652 = vmatprep.mubr.f32.mxu0 %v2995_v8 }
 0x140   : > { %653 = vmatmul.mubr.f32.gmra.mrb[28].mxu0 %v442_v0 }
 0x141   : > { %658 = vmatprep.mubr.f32.mxu0 %v2995_v8 }
 0x144   : > { %659 = vmatmul.mubr.f32.gmra.mrb[30].mxu0 %v443_v1 }
 0x145   : > { %664 = vmatprep.mubr.f32.mxu0 %v2995_v8 }
 0x148   : > { %665 = vmatmul.mubr.f32.gmra.mrb[32].mxu0 %v444_v2 }
 0x149   : > { %670 = vmatprep.mubr.f32.mxu0 %v2995_v8 }
 0x14c   : > { %671 = vmatmul.mubr.f32.gmra.mrb[34].mxu0 %v445_v3 }
 0x14d   : > { %676 = vmatprep.mubr.f32.mxu0 %v2995_v8 }
 0x150   : > { %677 = vmatmul.mubr.f32.gmra.mrb[36].mxu0 %v446_v4 }
 0x151   : > { %682 = vmatprep.mubr.f32.mxu0 %v2995_v8 }
 0x154   : > { %683 = vmatmul.mubr.f32.gmra.mrb[38].mxu0 %v447_v5 }
 0x155   : > { %688 = vmatprep.mubr.f32.mxu0 %v2995_v8 }
 0x158   : > { %689 = vmatmul.mubr.f32.gmra.mrb[40].mxu0 %v448_v6 }
 0x159   : > { %694 = vmatprep.mubr.f32.mxu0 %v2995_v8 }
 0x15c   : > { %695 = vmatmul.mubr.f32.gmra.mrb[42].mxu0 %v449_v7 }
 0x15d   : > { %700 = vmatprep.mubr.f32.mxu0 %v2995_v8 }
 0x160   : > { %701 = vmatmul.mubr.f32.gmra.mrb[44].mxu0 %v450_v9 }
 0x161   : > { %706 = vmatprep.mubr.f32.mxu0 %v2995_v8 }
 0x164   : > { %707 = vmatmul.mubr.f32.gmra.mrb[46].mxu0 %v451_v10 }
 0x165   : > { %712 = vmatprep.mubr.f32.mxu0 %v2995_v8 }
 0x168   : > { %713 = vmatmul.mubr.f32.gmra.mrb[48].mxu0 %v452_v11 }
 0x169   : > { %718 = vmatprep.mubr.f32.mxu0 %v2995_v8 }
 0x16c   : > { %719 = vmatmul.mubr.f32.gmra.mrb[50].mxu0 %v453_v12 }
 0x16d   : > { %724 = vmatprep.mubr.f32.mxu0 %v2995_v8 }
 0x170   : > { %725 = vmatmul.mubr.f32.gmra.mrb[52].mxu0 %v454_v13 }
 0x171   : > { %730 = vmatprep.mubr.f32.mxu0 %v2995_v8 }
 0x174   : > { %731 = vmatmul.mubr.f32.gmra.mrb[54].mxu0 %v455_v14 }
 0x175   : > { %736 = vmatprep.mubr.f32.mxu0 %v2995_v8 }
 0x178   : > { %737 = vmatmul.mubr.f32.gmra.mrb[56].mxu0 %v456_v15 }
 0x179   : > { %742 = vmatprep.mubr.f32.mxu0 %v2995_v8 }
 0x17c   : > { %743 = vmatmul.mubr.f32.gmra.mrb[58].mxu0 %v457_v16 }
 0x17d   : > { %748 = vmatprep.mubr.f32.mxu0 %v2995_v8 }
 0x180   : > { %749 = vmatmul.mubr.f32.gmra.mrb[60].mxu0 %v458_v17 }
 0x181   : > { %754 = vmatprep.mubr.f32.mxu0 %v2995_v8 }
 0x184   : > { %755 = vmatmul.mubr.f32.gmra.mrb[62].mxu0 %v459_v18 }
 0x1db   : > { %v570_v24 = vpop.f32.mrb[0].mxu0 }
 0x1dc   : > { %v572_v26 = vpop.f32.mrb[1].mxu0  ;;  %v571_v8 = vadd.f32 %v570_v24, %v3500_v25 }
 0x1dd   : > { %v573_v32 = vadd.f32 %v572_v26, %v3502_v27 }
 0x1df   : > { %v576_v29 = vpop.f32.mrb[2].mxu0 }
 0x1e0   : > { %v577_v30 = vadd.f32 %v576_v29, %v3500_v25  ;;  %v578_v31 = vpop.f32.mrb[3].mxu0 }
 0x1e1   : > { %v579_v33 = vadd.f32 %v578_v31, %v3502_v27 }
 0x1e2   : > { %v2214_v34 = vpack.c.bf16 %v577_v30, %v571_v8 }
 0x1e3   : > { %v2212_v35 = vpack.c.bf16 %v579_v33, %v573_v32  ;;  %v582_v36 = vpop.f32.mrb[4].mxu0 }
 0x1e4   : > { %v584_v37 = vpop.f32.mrb[5].mxu0  ;;  %v583_v39 = vadd.f32 %v582_v36, %v3500_v25 }
 0x1e5   : > { %2213 = vmatprep.subr.bf16.mxu0 %v2212_v35  ;;  %2308 = vmatprep.subr.bf16.mxu1 %v2212_v35  ;;  %v585_v42 = vadd.f32 %v584_v37, %v3502_v27 }
 0x1e6   : > { %2215 = vmatpush1.bf16.msra.mxu0 %v2214_v34  ;;  %2324 = vmatpush1.bf16.msra.mxu1 %v2214_v34 }
 0x1e7   : > { %v588_v38 = vpop.f32.mrb[6].mxu0 }
 0x1e8   : > { %v589_v40 = vadd.f32 %v588_v38, %v3500_v25  ;;  %v590_v41 = vpop.f32.mrb[7].mxu0 }
 0x1e9   : > { %v591_v43 = vadd.f32 %v590_v41, %v3502_v27 }
 0x1ea   : > { %v2218_v44 = vpack.c.bf16 %v589_v40, %v583_v39 }
 0x1eb   : > { %v2216_v45 = vpack.c.bf16 %v591_v43, %v585_v42  ;;  %v594_v46 = vpop.f32.mrb[8].mxu0 }
 0x1ec   : > { %v596_v47 = vpop.f32.mrb[9].mxu0  ;;  %v595_v49 = vadd.f32 %v594_v46, %v3500_v25 }
 0x1ed   : > { %2217 = vmatprep.subr.bf16.mxu0 %v2216_v45  ;;  %2309 = vmatprep.subr.bf16.mxu1 %v2216_v45  ;;  %v597_v52 = vadd.f32 %v596_v47, %v3502_v27 }
 0x1ee   : > { %2219 = vmatpush1.bf16.msra.mxu0 %v2218_v44  ;;  %2325 = vmatpush1.bf16.msra.mxu1 %v2218_v44 }
 0x1ef   : > { %v600_v48 = vpop.f32.mrb[10].mxu0 }
 0x1f0   : > { %v601_v50 = vadd.f32 %v600_v48, %v3500_v25  ;;  %v602_v51 = vpop.f32.mrb[11].mxu0 }
 0x1f1   : > { %v603_v53 = vadd.f32 %v602_v51, %v3502_v27 }
 0x1f2   : > { %v2222_v54 = vpack.c.bf16 %v601_v50, %v595_v49 }
 0x1f3   : > { %v2220_v55 = vpack.c.bf16 %v603_v53, %v597_v52  ;;  %v606_v56 = vpop.f32.mrb[12].mxu0 }
 0x1f4   : > { %v608_v57 = vpop.f32.mrb[13].mxu0  ;;  %v607_v59 = vadd.f32 %v606_v56, %v3500_v25 }
 0x1f5   : > { %2221 = vmatprep.subr.bf16.mxu0 %v2220_v55  ;;  %2310 = vmatprep.subr.bf16.mxu1 %v2220_v55  ;;  %v609_v62 = vadd.f32 %v608_v57, %v3502_v27 }
 0x1f6   : > { %2223 = vmatpush1.bf16.msra.mxu0 %v2222_v54  ;;  %2326 = vmatpush1.bf16.msra.mxu1 %v2222_v54 }
 0x1f7   : > { %v612_v58 = vpop.f32.mrb[14].mxu0 }
 0x1f8   : > { %v613_v60 = vadd.f32 %v612_v58, %v3500_v25  ;;  %v614_v61 = vpop.f32.mrb[15].mxu0 }
 0x1f9   : > { %v615_v63 = vadd.f32 %v614_v61, %v3502_v27 }
 0x1fa   : > { %v2226_v0 = vpack.c.bf16 %v613_v60, %v607_v59 }
 0x1fb   : > { %v2224_v1 = vpack.c.bf16 %v615_v63, %v609_v62  ;;  %v618_v2 = vpop.f32.mrb[16].mxu0 }
 0x1fc   : > { %v620_v3 = vpop.f32.mrb[17].mxu0  ;;  %v619_v5 = vadd.f32 %v618_v2, %v3500_v25 }
 0x1fd   : > { %2225 = vmatprep.subr.bf16.mxu0 %v2224_v1  ;;  %2311 = vmatprep.subr.bf16.mxu1 %v2224_v1  ;;  %v621_v9 = vadd.f32 %v620_v3, %v3502_v27 }
 0x1fe   : > { %2227 = vmatpush1.bf16.msra.mxu0 %v2226_v0  ;;  %2327 = vmatpush1.bf16.msra.mxu1 %v2226_v0 }
 0x1ff   : > { %v624_v4 = vpop.f32.mrb[18].mxu0 }
 0x200   : > { %v625_v6 = vadd.f32 %v624_v4, %v3500_v25  ;;  %v626_v7 = vpop.f32.mrb[19].mxu0 }
 0x201   : > { %v627_v10 = vadd.f32 %v626_v7, %v3502_v27 }
 0x202   : > { %v2230_v11 = vpack.c.bf16 %v625_v6, %v619_v5 }
 0x203   : > { %v2228_v12 = vpack.c.bf16 %v627_v10, %v621_v9  ;;  %v630_v13 = vpop.f32.mrb[20].mxu0 }
 0x204   : > { %v632_v14 = vpop.f32.mrb[21].mxu0  ;;  %v631_v16 = vadd.f32 %v630_v13, %v3500_v25 }
 0x205   : > { %2229 = vmatprep.subr.bf16.mxu0 %v2228_v12  ;;  %2312 = vmatprep.subr.bf16.mxu1 %v2228_v12  ;;  %v633_v19 = vadd.f32 %v632_v14, %v3502_v27 }
 0x206   : > { %2231 = vmatpush1.bf16.msra.mxu0 %v2230_v11  ;;  %2328 = vmatpush1.bf16.msra.mxu1 %v2230_v11 }
 0x207   : > { %v636_v15 = vpop.f32.mrb[22].mxu0 }
 0x208   : > { %v637_v17 = vadd.f32 %v636_v15, %v3500_v25  ;;  %v638_v18 = vpop.f32.mrb[23].mxu0 }
 0x209   : > { %v639_v20 = vadd.f32 %v638_v18, %v3502_v27 }
 0x20a   : > { %v2234_v21 = vpack.c.bf16 %v637_v17, %v631_v16 }
 0x20b   : > { %v2232_v22 = vpack.c.bf16 %v639_v20, %v633_v19  ;;  %v642_v23 = vpop.f32.mrb[24].mxu0 }
 0x20c   : > { %v644_v24 = vpop.f32.mrb[25].mxu0  ;;  %v643_v28 = vadd.f32 %v642_v23, %v3500_v25  ;;  %v826_v23 = vld [vmem:[%s3349_s7 + $0x8] sm:$0xff] }
 0x20d   : > { %2233 = vmatprep.subr.bf16.mxu0 %v2232_v22  ;;  %2313 = vmatprep.subr.bf16.mxu1 %v2232_v22  ;;  %v645_v30 = vadd.f32 %v644_v24, %v3502_v27 }
 0x20e   : > { %2235 = vmatpush1.bf16.msra.mxu0 %v2234_v21  ;;  %2329 = vmatpush1.bf16.msra.mxu1 %v2234_v21 }
 0x20f   : > { %v648_v26 = vpop.f32.mrb[26].mxu0  ;;  %953 = vmatprep.mubr.f32.mxu0 %v826_v23  ;;  %v851_v23 = vld [vmem:[%s3349_s7 + $0xd0] sm:$0xff] }
 0x210   : > { %v649_v29 = vadd.f32 %v648_v26, %v3500_v25  ;;  %v650_v8 = vpop.f32.mrb[27].mxu0 }
 0x211   : > { %v651_v31 = vadd.f32 %v650_v8, %v3502_v27 }
 0x212   : > { %v2238_v32 = vpack.c.bf16 %v649_v29, %v643_v28 }
 0x213   : > { %v2236_v33 = vpack.c.bf16 %v651_v31, %v645_v30  ;;  %v654_v34 = vpop.f32.mrb[28].mxu0 }
 0x214   : > { %v656_v35 = vpop.f32.mrb[29].mxu0  ;;  %v655_v37 = vadd.f32 %v654_v34, %v3500_v25 }
 0x215   : > { %2237 = vmatprep.subr.bf16.mxu0 %v2236_v33  ;;  %2314 = vmatprep.subr.bf16.mxu1 %v2236_v33  ;;  %v657_v40 = vadd.f32 %v656_v35, %v3502_v27 }
 0x216   : > { %2239 = vmatpush1.bf16.msra.mxu0 %v2238_v32  ;;  %2330 = vmatpush1.bf16.msra.mxu1 %v2238_v32 }
 0x217   : > { %v660_v36 = vpop.f32.mrb[30].mxu0 }
 0x218   : > { %v661_v38 = vadd.f32 %v660_v36, %v3500_v25  ;;  %v662_v39 = vpop.f32.mrb[31].mxu0 }
 0x219   : > { %v663_v41 = vadd.f32 %v662_v39, %v3502_v27 }
 0x21a   : > { %v2242_v42 = vpack.c.bf16 %v661_v38, %v655_v37 }
 0x21b   : > { %v2240_v43 = vpack.c.bf16 %v663_v41, %v657_v40  ;;  %v666_v44 = vpop.f32.mrb[32].mxu0 }
 0x21c   : > { %v668_v45 = vpop.f32.mrb[33].mxu0  ;;  %v667_v47 = vadd.f32 %v666_v44, %v3500_v25 }
 0x21d   : > { %2241 = vmatprep.subr.bf16.mxu0 %v2240_v43  ;;  %2315 = vmatprep.subr.bf16.mxu1 %v2240_v43  ;;  %v669_v50 = vadd.f32 %v668_v45, %v3502_v27 }
 0x21e   : > { %2243 = vmatpush1.bf16.msra.mxu0 %v2242_v42  ;;  %2331 = vmatpush1.bf16.msra.mxu1 %v2242_v42 }
 0x21f   : > { %v672_v46 = vpop.f32.mrb[34].mxu0 }
 0x220   : > { %v673_v48 = vadd.f32 %v672_v46, %v3500_v25  ;;  %v674_v49 = vpop.f32.mrb[35].mxu0 }
 0x221   : > { %v675_v51 = vadd.f32 %v674_v49, %v3502_v27 }
 0x222   : > { %v2246_v52 = vpack.c.bf16 %v673_v48, %v667_v47 }
 0x223   : > { %v2244_v53 = vpack.c.bf16 %v675_v51, %v669_v50  ;;  %v678_v54 = vpop.f32.mrb[36].mxu0 }
 0x224   : > { %v680_v55 = vpop.f32.mrb[37].mxu0  ;;  %v679_v57 = vadd.f32 %v678_v54, %v3500_v25 }
 0x225   : > { %2245 = vmatprep.subr.bf16.mxu0 %v2244_v53  ;;  %2316 = vmatprep.subr.bf16.mxu1 %v2244_v53  ;;  %v681_v60 = vadd.f32 %v680_v55, %v3502_v27 }
 0x226   : > { %2247 = vmatpush1.bf16.msra.mxu0 %v2246_v52  ;;  %2332 = vmatpush1.bf16.msra.mxu1 %v2246_v52 }
 0x227   : > { %v684_v56 = vpop.f32.mrb[38].mxu0 }
 0x228   : > { %v685_v58 = vadd.f32 %v684_v56, %v3500_v25  ;;  %v686_v59 = vpop.f32.mrb[39].mxu0 }
 0x229   : > { %v687_v61 = vadd.f32 %v686_v59, %v3502_v27 }
 0x22a   : > { %v2250_v62 = vpack.c.bf16 %v685_v58, %v679_v57 }
 0x22b   : > { %v2248_v63 = vpack.c.bf16 %v687_v61, %v681_v60  ;;  %v690_v0 = vpop.f32.mrb[40].mxu0 }
 0x22c   : > { %v692_v1 = vpop.f32.mrb[41].mxu0  ;;  %v691_v3 = vadd.f32 %v690_v0, %v3500_v25  ;;  %v825_v0 = vld [vmem:[%s3349_s7] sm:$0xff] }
 0x22d   : > { %2249 = vmatprep.subr.bf16.mxu0 %v2248_v63  ;;  %2317 = vmatprep.subr.bf16.mxu1 %v2248_v63  ;;  %v693_v6 = vadd.f32 %v692_v1, %v3502_v27  ;;  %v833_v63 = vld [vmem:[%s3349_s7 + $0x40] sm:$0xff]  ;;  %v828_v1 = vld [vmem:[%s3349_s7 + $0x18] sm:$0xff] }
 0x22e   : > { %2251 = vmatpush1.bf16.msra.mxu0 %v2250_v62  ;;  %2333 = vmatpush1.bf16.msra.mxu1 %v2250_v62 }
 0x22f   : > { %v696_v2 = vpop.f32.mrb[42].mxu0 }
 0x230   : > { %v697_v4 = vadd.f32 %v696_v2, %v3500_v25  ;;  %v698_v5 = vpop.f32.mrb[43].mxu0  ;;  %v827_v2 = vld [vmem:[%s3349_s7 + $0x10] sm:$0xff] }
 0x231   : > { %v699_v7 = vadd.f32 %v698_v5, %v3502_v27  ;;  %v837_v5 = vld [vmem:[%s3349_s7 + $0x60] sm:$0xff] }
 0x232   : > { %v2254_v9 = vpack.c.bf16 %v697_v4, %v691_v3  ;;  %v838_v3 = vld [vmem:[%s3349_s7 + $0x68] sm:$0xff] }
 0x233   : > { %v2252_v10 = vpack.c.bf16 %v699_v7, %v693_v6  ;;  %v702_v11 = vpop.f32.mrb[44].mxu0  ;;  %v830_v4 = vld [vmem:[%s3349_s7 + $0x28] sm:$0xff]  ;;  %v829_v6 = vld [vmem:[%s3349_s7 + $0x20] sm:$0xff]  ;;  %v840_v7 = vld [vmem:[%s3349_s7 + $0x78] sm:$0xff] }
 0x234   : > { %v704_v12 = vpop.f32.mrb[45].mxu0  ;;  %v703_v14 = vadd.f32 %v702_v11, %v3500_v25  ;;  %v831_v11 = vld [vmem:[%s3349_s7 + $0x30] sm:$0xff] }
 0x235   : > { %2253 = vmatprep.subr.bf16.mxu0 %v2252_v10  ;;  %2318 = vmatprep.subr.bf16.mxu1 %v2252_v10  ;;  %v705_v17 = vadd.f32 %v704_v12, %v3502_v27  ;;  %v839_v10 = vld [vmem:[%s3349_s7 + $0x70] sm:$0xff]  ;;  %v842_v12 = vld [vmem:[%s3349_s7 + $0x88] sm:$0xff] }
 0x236   : > { %2255 = vmatpush1.bf16.msra.mxu0 %v2254_v9  ;;  %2334 = vmatpush1.bf16.msra.mxu1 %v2254_v9  ;;  %v832_v9 = vld [vmem:[%s3349_s7 + $0x38] sm:$0xff] }
 0x237   : > { %v708_v13 = vpop.f32.mrb[46].mxu0 }
 0x238   : > { %v709_v15 = vadd.f32 %v708_v13, %v3500_v25  ;;  %v710_v16 = vpop.f32.mrb[47].mxu0  ;;  %v841_v13 = vld [vmem:[%s3349_s7 + $0x80] sm:$0xff] }
 0x239   : > { %v711_v18 = vadd.f32 %v710_v16, %v3502_v27  ;;  %v846_v16 = vld [vmem:[%s3349_s7 + $0xa8] sm:$0xff] }
 0x23a   : > { %v2258_v19 = vpack.c.bf16 %v709_v15, %v703_v14  ;;  %v844_v14 = vld [vmem:[%s3349_s7 + $0x98] sm:$0xff]  ;;  %v843_v15 = vld [vmem:[%s3349_s7 + $0x90] sm:$0xff] }
 0x23b   : > { %v2256_v20 = vpack.c.bf16 %v711_v18, %v705_v17  ;;  %v714_v21 = vpop.f32.mrb[48].mxu0  ;;  %v845_v17 = vld [vmem:[%s3349_s7 + $0xa0] sm:$0xff]  ;;  %v848_v18 = vld [vmem:[%s3349_s7 + $0xb8] sm:$0xff] }
 0x23c   : > { %v716_v22 = vpop.f32.mrb[49].mxu0  ;;  %v715_v26 = vadd.f32 %v714_v21, %v3500_v25  ;;  %v849_v21 = vld [vmem:[%s3349_s7 + $0xc0] sm:$0xff] }
 0x23d   : > { %2257 = vmatprep.subr.bf16.mxu0 %v2256_v20  ;;  %2319 = vmatprep.subr.bf16.mxu1 %v2256_v20  ;;  %v717_v8 = vadd.f32 %v716_v22, %v3502_v27  ;;  %v850_v20 = vld [vmem:[%s3349_s7 + $0xc8] sm:$0xff]  ;;  %v852_v22 = vld [vmem:[%s3349_s7 + $0xd8] sm:$0xff] }
 0x23e   : > { %2259 = vmatpush1.bf16.msra.mxu0 %v2258_v19  ;;  %2335 = vmatpush1.bf16.msra.mxu1 %v2258_v19  ;;  %v847_v19 = vld [vmem:[%s3349_s7 + $0xb0] sm:$0xff] }
 0x23f   : > { %v720_v24 = vpop.f32.mrb[50].mxu0 }
 0x240   : > { %v721_v28 = vadd.f32 %v720_v24, %v3500_v25  ;;  %v722_v29 = vpop.f32.mrb[51].mxu0  ;;  %v854_v24 = vld [vmem:[%s3349_s7 + $0xe8] sm:$0xff] }
 0x241   : > { %v723_v30 = vadd.f32 %v722_v29, %v3502_v27  ;;  %v855_v29 = vld [vmem:[%s3349_s7 + $0xf0] sm:$0xff] }
 0x242   : > { %v2262_v31 = vpack.c.bf16 %v721_v28, %v715_v26  ;;  %v853_v26 = vld [vmem:[%s3349_s7 + $0xe0] sm:$0xff]  ;;  %v856_v28 = vld [vmem:[%s3349_s7 + $0xf8] sm:$0xff] }
 0x243   : > { %v2260_v32 = vpack.c.bf16 %v723_v30, %v717_v8  ;;  %v726_v33 = vpop.f32.mrb[52].mxu0  ;;  %v858_v8 = vld [vmem:[%s3349_s7 + $0x108] sm:$0xff]  ;;  %v857_v30 = vld [vmem:[%s3349_s7 + $0x100] sm:$0xff] }
 0x244   : > { %v728_v34 = vpop.f32.mrb[53].mxu0  ;;  %v727_v36 = vadd.f32 %v726_v33, %v3500_v25  ;;  %v862_v33 = vld [vmem:[%s3349_s7 + $0x128] sm:$0xff] }
 0x245   : > { %2261 = vmatprep.subr.bf16.mxu0 %v2260_v32  ;;  %2320 = vmatprep.subr.bf16.mxu1 %v2260_v32  ;;  %v729_v39 = vadd.f32 %v728_v34, %v3502_v27  ;;  %v859_v32 = vld [vmem:[%s3349_s7 + $0x110] sm:$0xff]  ;;  %v861_v34 = vld [vmem:[%s3349_s7 + $0x120] sm:$0xff] }
 0x246   : > { %2263 = vmatpush1.bf16.msra.mxu0 %v2262_v31  ;;  %2336 = vmatpush1.bf16.msra.mxu1 %v2262_v31  ;;  %v860_v31 = vld [vmem:[%s3349_s7 + $0x118] sm:$0xff] }
 0x247   : > { %v732_v35 = vpop.f32.mrb[54].mxu0 }
 0x248   : > { %v733_v37 = vadd.f32 %v732_v35, %v3500_v25  ;;  %v734_v38 = vpop.f32.mrb[55].mxu0  ;;  %v864_v35 = vld [vmem:[%s3349_s7 + $0x138] sm:$0xff] }
 0x249   : > { %v735_v40 = vadd.f32 %v734_v38, %v3502_v27  ;;  %v865_v38 = vld [vmem:[%s3349_s7 + $0x140] sm:$0xff] }
 0x24a   : > { %v2266_v41 = vpack.c.bf16 %v733_v37, %v727_v36  ;;  %v863_v36 = vld [vmem:[%s3349_s7 + $0x130] sm:$0xff]  ;;  %v866_v37 = vld [vmem:[%s3349_s7 + $0x148] sm:$0xff] }
 0x24b   : > { %v2264_v42 = vpack.c.bf16 %v735_v40, %v729_v39  ;;  %v738_v43 = vpop.f32.mrb[56].mxu0  ;;  %v868_v39 = vld [vmem:[%s3349_s7 + $0x158] sm:$0xff]  ;;  %v867_v40 = vld [vmem:[%s3349_s7 + $0x150] sm:$0xff] }
 0x24c   : > { %v740_v44 = vpop.f32.mrb[57].mxu0  ;;  %v739_v46 = vadd.f32 %v738_v43, %v3500_v25  ;;  %v872_v43 = vld [vmem:[%s3349_s7 + $0x178] sm:$0xff] }
 0x24d   : > { %2265 = vmatprep.subr.bf16.mxu0 %v2264_v42  ;;  %2321 = vmatprep.subr.bf16.mxu1 %v2264_v42  ;;  %v741_v49 = vadd.f32 %v740_v44, %v3502_v27  ;;  %v869_v42 = vld [vmem:[%s3349_s7 + $0x160] sm:$0xff]  ;;  %v871_v44 = vld [vmem:[%s3349_s7 + $0x170] sm:$0xff] }
 0x24e   : > { %2267 = vmatpush1.bf16.msra.mxu0 %v2266_v41  ;;  %2337 = vmatpush1.bf16.msra.mxu1 %v2266_v41  ;;  %v870_v41 = vld [vmem:[%s3349_s7 + $0x168] sm:$0xff] }
 0x24f   : > { %v744_v45 = vpop.f32.mrb[58].mxu0 }
 0x250   : > { %v745_v47 = vadd.f32 %v744_v45, %v3500_v25  ;;  %v746_v48 = vpop.f32.mrb[59].mxu0  ;;  %v874_v45 = vld [vmem:[%s3349_s7 + $0x188] sm:$0xff] }
 0x251   : > { %v747_v50 = vadd.f32 %v746_v48, %v3502_v27  ;;  %v875_v48 = vld [vmem:[%s3349_s7 + $0x190] sm:$0xff] }
 0x252   : > { %v2270_v51 = vpack.c.bf16 %v745_v47, %v739_v46  ;;  %v873_v46 = vld [vmem:[%s3349_s7 + $0x180] sm:$0xff]  ;;  %v876_v47 = vld [vmem:[%s3349_s7 + $0x198] sm:$0xff] }
 0x253   : > { %v2268_v52 = vpack.c.bf16 %v747_v50, %v741_v49  ;;  %v750_v53 = vpop.f32.mrb[60].mxu0  ;;  %v878_v49 = vld [vmem:[%s3349_s7 + $0x1a8] sm:$0xff]  ;;  %v877_v50 = vld [vmem:[%s3349_s7 + $0x1a0] sm:$0xff] }
 0x254   : > { %v752_v54 = vpop.f32.mrb[61].mxu0  ;;  %v751_v56 = vadd.f32 %v750_v53, %v3500_v25  ;;  %v882_v53 = vld [vmem:[%s3349_s7 + $0x1c8] sm:$0xff] }
 0x255   : > { %2269 = vmatprep.subr.bf16.mxu0 %v2268_v52  ;;  %2322 = vmatprep.subr.bf16.mxu1 %v2268_v52  ;;  %v753_v59 = vadd.f32 %v752_v54, %v3502_v27  ;;  %v879_v52 = vld [vmem:[%s3349_s7 + $0x1b0] sm:$0xff]  ;;  %v881_v54 = vld [vmem:[%s3349_s7 + $0x1c0] sm:$0xff] }
 0x256   : > { %2271 = vmatpush1.bf16.msra.mxu0 %v2270_v51  ;;  %2338 = vmatpush1.bf16.msra.mxu1 %v2270_v51  ;;  %v880_v51 = vld [vmem:[%s3349_s7 + $0x1b8] sm:$0xff] }
 0x257   : > { %v756_v55 = vpop.f32.mrb[62].mxu0 }
 0x258   : > { %v757_v57 = vadd.f32 %v756_v55, %v3500_v25  ;;  %v758_v58 = vpop.f32.mrb[63].mxu0  ;;  %v836_v25 = vld [vmem:[%s3349_s7 + $0x58] sm:$0xff] }
 0x259   : > { %v759_v60 = vadd.f32 %v758_v58, %v3502_v27  ;;  %v835_v27 = vld [vmem:[%s3349_s7 + $0x50] sm:$0xff]  ;;  %v884_v55 = vld [vmem:[%s3349_s7 + $0x1d8] sm:$0xff]  ;;  %v885_v58 = vld [vmem:[%s3349_s7 + $0x1e0] sm:$0xff] }
 0x25a   : > { %v2274_v61 = vpack.c.bf16 %v757_v57, %v751_v56  ;;  %v883_v56 = vld [vmem:[%s3349_s7 + $0x1d0] sm:$0xff]  ;;  %v886_v57 = vld [vmem:[%s3349_s7 + $0x1e8] sm:$0xff] }
 0x25b   : > { %v2272_v62 = vpack.c.bf16 %v759_v60, %v753_v59  ;;  %v888_v59 = vld [vmem:[%s3349_s7 + $0x1f8] sm:$0xff]  ;;  %v887_v60 = vld [vmem:[%s3349_s7 + $0x1f0] sm:$0xff] }
 0x25d   : > { %2273 = vmatprep.subr.bf16.mxu0 %v2272_v62  ;;  %2323 = vmatprep.subr.bf16.mxu1 %v2272_v62  ;;  %v761_v62 = vld [vmem:[#allocation2] sm:$0xff] }
 0x25e   : > { %2275 = vmatpush1.bf16.msra.mxu0 %v2274_v61  ;;  %2339 = vmatpush1.bf16.msra.mxu1 %v2274_v61  ;;  %v769_v61 = vld [vmem:[#allocation2 + $0x40] sm:$0xff] }
 0x261   : > { %978 = vmatmul.mubr.f32.vlgmr.msra.gmra.mrb[0].mxu1 %v833_v63  ;;  %954 = vmatmul.mubr.f32.vlgmr.msra.gmra.mrb[64].mxu0 %v825_v0  ;;  %v770_v63 = vld [vmem:[#allocation2 + $0x48] sm:$0xff] }
 0x262   : > { %983 = vmatprep.mubr.f32.mxu1 %v836_v25  ;;  %959 = vmatprep.mubr.f32.mxu0 %v828_v1  ;;  %v762_v0 = vld [vmem:[#allocation2 + $0x8] sm:$0xff] }
 0x265   : > { %984 = vmatmul.mubr.f32.gmra.mrb[2].mxu1 %v835_v27  ;;  %960 = vmatmul.mubr.f32.gmra.mrb[66].mxu0 %v827_v2 }
 0x266   : > { %989 = vmatprep.mubr.f32.mxu1 %v838_v3  ;;  %965 = vmatprep.mubr.f32.mxu0 %v830_v4 }
 0x269   : > { %990 = vmatmul.mubr.f32.gmra.mrb[4].mxu1 %v837_v5  ;;  %966 = vmatmul.mubr.f32.gmra.mrb[68].mxu0 %v829_v6  ;;  %v771_v6 = vld [vmem:[#allocation2 + $0x50] sm:$0xff] }
 0x26a   : > { %995 = vmatprep.mubr.f32.mxu1 %v840_v7  ;;  %971 = vmatprep.mubr.f32.mxu0 %v832_v9  ;;  %v763_v9 = vld [vmem:[#allocation2 + $0x10] sm:$0xff] }
 0x26d   : > { %996 = vmatmul.mubr.f32.gmra.mrb[6].mxu1 %v839_v10  ;;  %972 = vmatmul.mubr.f32.gmra.mrb[70].mxu0 %v831_v11  ;;  %v772_v10 = vld [vmem:[#allocation2 + $0x58] sm:$0xff] }
 0x26e   : > { %1001 = vmatprep.mubr.f32.mxu1 %v842_v12  ;;  %v764_v11 = vld [vmem:[#allocation2 + $0x18] sm:$0xff] }
 0x271   : > { %1002 = vmatmul.mubr.f32.gmra.mrb[8].mxu1 %v841_v13 }
 0x272   : > { %1007 = vmatprep.mubr.f32.mxu1 %v844_v14 }
 0x275   : > { %1008 = vmatmul.mubr.f32.gmra.mrb[10].mxu1 %v843_v15 }
 0x276   : > { %1013 = vmatprep.mubr.f32.mxu1 %v846_v16 }
 0x279   : > { %1014 = vmatmul.mubr.f32.gmra.mrb[12].mxu1 %v845_v17 }
 0x27a   : > { %1019 = vmatprep.mubr.f32.mxu1 %v848_v18 }
 0x27d   : > { %1020 = vmatmul.mubr.f32.gmra.mrb[14].mxu1 %v847_v19  ;;  %v773_v19 = vld [vmem:[#allocation2 + $0x60] sm:$0xff] }
 0x27e   : > { %1025 = vmatprep.mubr.f32.mxu1 %v850_v20 }
 0x281   : > { %1026 = vmatmul.mubr.f32.gmra.mrb[16].mxu1 %v849_v21  ;;  %v765_v21 = vld [vmem:[#allocation2 + $0x20] sm:$0xff] }
 0x282   : > { %1031 = vmatprep.mubr.f32.mxu1 %v852_v22  ;;  %v774_v22 = vld [vmem:[#allocation2 + $0x68] sm:$0xff] }
 0x285   : > { %1032 = vmatmul.mubr.f32.gmra.mrb[18].mxu1 %v851_v23  ;;  %v766_v23 = vld [vmem:[#allocation2 + $0x28] sm:$0xff] }
 0x286   : > { %1037 = vmatprep.mubr.f32.mxu1 %v854_v24 }
 0x289   : > { %1038 = vmatmul.mubr.f32.gmra.mrb[20].mxu1 %v853_v26 }
 0x28a   : > { %1043 = vmatprep.mubr.f32.mxu1 %v856_v28 }
 0x28d   : > { %1044 = vmatmul.mubr.f32.gmra.mrb[22].mxu1 %v855_v29 }
 0x28e   : > { %1049 = vmatprep.mubr.f32.mxu1 %v858_v8 }
 0x291   : > { %1050 = vmatmul.mubr.f32.gmra.mrb[24].mxu1 %v857_v30 }
 0x292   : > { %1055 = vmatprep.mubr.f32.mxu1 %v860_v31 }
 0x295   : > { %1056 = vmatmul.mubr.f32.gmra.mrb[26].mxu1 %v859_v32  ;;  %v775_v32 = vld [vmem:[#allocation2 + $0x70] sm:$0xff] }
 0x296   : > { %1061 = vmatprep.mubr.f32.mxu1 %v862_v33 }
 0x299   : > { %1062 = vmatmul.mubr.f32.gmra.mrb[28].mxu1 %v861_v34  ;;  %v767_v34 = vld [vmem:[#allocation2 + $0x30] sm:$0xff] }
 0x29a   : > { %1067 = vmatprep.mubr.f32.mxu1 %v864_v35  ;;  %v776_v35 = vld [vmem:[#allocation2 + $0x78] sm:$0xff] }
 0x29d   : > { %1068 = vmatmul.mubr.f32.gmra.mrb[30].mxu1 %v863_v36  ;;  %v768_v36 = vld [vmem:[#allocation2 + $0x38] sm:$0xff] }
 0x29e   : > { %1073 = vmatprep.mubr.f32.mxu1 %v866_v37 }
 0x2a1   : > { %1074 = vmatmul.mubr.f32.gmra.mrb[32].mxu1 %v865_v38 }
 0x2a2   : > { %1079 = vmatprep.mubr.f32.mxu1 %v868_v39 }
 0x2a5   : > { %1080 = vmatmul.mubr.f32.gmra.mrb[34].mxu1 %v867_v40 }
 0x2a6   : > { %1085 = vmatprep.mubr.f32.mxu1 %v870_v41 }
 0x2a9   : > { %1086 = vmatmul.mubr.f32.gmra.mrb[36].mxu1 %v869_v42 }
 0x2aa   : > { %1091 = vmatprep.mubr.f32.mxu1 %v872_v43 }
 0x2ad   : > { %1092 = vmatmul.mubr.f32.gmra.mrb[38].mxu1 %v871_v44  ;;  %v777_v44 = vld [vmem:[#allocation2 + $0x80] sm:$0xff] }
 0x2ae   : > { %1097 = vmatprep.mubr.f32.mxu1 %v874_v45 }
 0x2b1   : > { %1098 = vmatmul.mubr.f32.gmra.mrb[40].mxu1 %v873_v46  ;;  %v778_v46 = vld [vmem:[#allocation2 + $0x88] sm:$0xff] }
 0x2b2   : > { %1103 = vmatprep.mubr.f32.mxu1 %v876_v47 }
 0x2b5   : > { %1104 = vmatmul.mubr.f32.gmra.mrb[42].mxu1 %v875_v48 }
 0x2b6   : > { %1109 = vmatprep.mubr.f32.mxu1 %v878_v49 }
 0x2b9   : > { %1110 = vmatmul.mubr.f32.gmra.mrb[44].mxu1 %v877_v50 }
 0x2ba   : > { %1115 = vmatprep.mubr.f32.mxu1 %v880_v51  ;;  %v779_v51 = vld [vmem:[#allocation2 + $0x90] sm:$0xff] }
 0x2bd   : > { %1116 = vmatmul.mubr.f32.gmra.mrb[46].mxu1 %v879_v52  ;;  %v780_v52 = vld [vmem:[#allocation2 + $0x98] sm:$0xff] }
 0x2be   : > { %1121 = vmatprep.mubr.f32.mxu1 %v882_v53 }
 0x2c1   : > { %1122 = vmatmul.mubr.f32.gmra.mrb[48].mxu1 %v881_v54 }
 0x2c2   : > { %1127 = vmatprep.mubr.f32.mxu1 %v884_v55 }
 0x2c5   : > { %1128 = vmatmul.mubr.f32.gmra.mrb[50].mxu1 %v883_v56 }
 0x2c6   : > { %1133 = vmatprep.mubr.f32.mxu1 %v886_v57  ;;  %v781_v57 = vld [vmem:[#allocation2 + $0xa0] sm:$0xff] }
 0x2c9   : > { %1134 = vmatmul.mubr.f32.gmra.mrb[52].mxu1 %v885_v58  ;;  %v782_v58 = vld [vmem:[#allocation2 + $0xa8] sm:$0xff] }
 0x2ca   : > { %1139 = vmatprep.mubr.f32.mxu1 %v888_v59 }
 0x2cd   : > { %1140 = vmatmul.mubr.f32.gmra.mrb[54].mxu1 %v887_v60 }
 0x334   : > { %v979_v25 = vpop.f32.mrb[0].mxu1  ;;  %v955_v1 = vpop.f32.mrb[64].mxu0 }
 0x335   : > { %v1154_v27 = vadd.f32 %v979_v25, %v769_v61  ;;  %v981_v2 = vpop.f32.mrb[1].mxu1  ;;  %v1146_v3 = vadd.f32 %v955_v1, %v761_v62  ;;  %v957_v4 = vpop.f32.mrb[65].mxu0 }
 0x336   : > { %v1155_v5 = vadd.f32 %v981_v2, %v770_v63  ;;  %v1147_v7 = vadd.f32 %v957_v4, %v762_v0  ;;  %v783_v63 = vld [vmem:[#allocation2 + $0xb0] sm:$0xff]  ;;  %v784_v0 = vld [vmem:[#allocation2 + $0xb8] sm:$0xff]  ;;  %v786_v4 = vld [vmem:[#allocation2 + $0xc8] sm:$0xff] }
 0x337   : > { %1218 = vst [vmem:[#allocation2 + $0x40] sm:$0xff] %v1154_v27  ;;  %1210 = vst [vmem:[#allocation2] sm:$0xff] %v1146_v3  ;;  %v785_v3 = vld [vmem:[#allocation2 + $0xc0] sm:$0xff] }
 0x338   : > { %1219 = vst [vmem:[#allocation2 + $0x48] sm:$0xff] %v1155_v5  ;;  %v985_v12 = vpop.f32.mrb[2].mxu1  ;;  %1211 = vst [vmem:[#allocation2 + $0x8] sm:$0xff] %v1147_v7  ;;  %v961_v13 = vpop.f32.mrb[66].mxu0 }
 0x339   : > { %v1156_v14 = vadd.f32 %v985_v12, %v771_v6  ;;  %v987_v15 = vpop.f32.mrb[3].mxu1  ;;  %v1148_v16 = vadd.f32 %v961_v13, %v763_v9  ;;  %v963_v17 = vpop.f32.mrb[67].mxu0 }
 0x33a   : > { %v1157_v18 = vadd.f32 %v987_v15, %v772_v10  ;;  %v1149_v20 = vadd.f32 %v963_v17, %v764_v11  ;;  %v787_v10 = vld [vmem:[#allocation2 + $0xd0] sm:$0xff]  ;;  %v788_v11 = vld [vmem:[#allocation2 + $0xd8] sm:$0xff]  ;;  %v790_v17 = vld [vmem:[#allocation2 + $0xe8] sm:$0xff] }
 0x33b   : > { %1220 = vst [vmem:[#allocation2 + $0x50] sm:$0xff] %v1156_v14  ;;  %1212 = vst [vmem:[#allocation2 + $0x10] sm:$0xff] %v1148_v16  ;;  %v789_v16 = vld [vmem:[#allocation2 + $0xe0] sm:$0xff] }
 0x33c   : > { %1221 = vst [vmem:[#allocation2 + $0x58] sm:$0xff] %v1157_v18  ;;  %v991_v24 = vpop.f32.mrb[4].mxu1  ;;  %1213 = vst [vmem:[#allocation2 + $0x18] sm:$0xff] %v1149_v20  ;;  %v967_v26 = vpop.f32.mrb[68].mxu0 }
 0x33d   : > { %v1158_v28 = vadd.f32 %v991_v24, %v773_v19  ;;  %v993_v29 = vpop.f32.mrb[5].mxu1  ;;  %v1150_v8 = vadd.f32 %v967_v26, %v765_v21  ;;  %v969_v30 = vpop.f32.mrb[69].mxu0 }
 0x33e   : > { %v1159_v31 = vadd.f32 %v993_v29, %v774_v22  ;;  %v1151_v33 = vadd.f32 %v969_v30, %v766_v23  ;;  %v791_v22 = vld [vmem:[#allocation2 + $0xf0] sm:$0xff]  ;;  %v792_v23 = vld [vmem:[#allocation2 + $0xf8] sm:$0xff]  ;;  %v794_v30 = vld [vmem:[#allocation2 + $0x108] sm:$0xff] }
 0x33f   : > { %1222 = vst [vmem:[#allocation2 + $0x60] sm:$0xff] %v1158_v28  ;;  %1214 = vst [vmem:[#allocation2 + $0x20] sm:$0xff] %v1150_v8  ;;  %v793_v8 = vld [vmem:[#allocation2 + $0x100] sm:$0xff] }
 0x340   : > { %1223 = vst [vmem:[#allocation2 + $0x68] sm:$0xff] %v1159_v31  ;;  %v997_v37 = vpop.f32.mrb[6].mxu1  ;;  %1215 = vst [vmem:[#allocation2 + $0x28] sm:$0xff] %v1151_v33  ;;  %v973_v38 = vpop.f32.mrb[70].mxu0 }
 0x341   : > { %v1160_v39 = vadd.f32 %v997_v37, %v775_v32  ;;  %v999_v40 = vpop.f32.mrb[7].mxu1  ;;  %v1152_v41 = vadd.f32 %v973_v38, %v767_v34  ;;  %v975_v42 = vpop.f32.mrb[71].mxu0 }
 0x342   : > { %v1161_v43 = vadd.f32 %v999_v40, %v776_v35  ;;  %v1153_v45 = vadd.f32 %v975_v42, %v768_v36  ;;  %v795_v35 = vld [vmem:[#allocation2 + $0x110] sm:$0xff]  ;;  %v796_v36 = vld [vmem:[#allocation2 + $0x118] sm:$0xff]  ;;  %v798_v42 = vld [vmem:[#allocation2 + $0x128] sm:$0xff] }
 0x343   : > { %1224 = vst [vmem:[#allocation2 + $0x70] sm:$0xff] %v1160_v39  ;;  %1216 = vst [vmem:[#allocation2 + $0x30] sm:$0xff] %v1152_v41  ;;  %v797_v41 = vld [vmem:[#allocation2 + $0x120] sm:$0xff] }
 0x344   : > { %1225 = vst [vmem:[#allocation2 + $0x78] sm:$0xff] %v1161_v43  ;;  %v1003_v47 = vpop.f32.mrb[8].mxu1  ;;  %1217 = vst [vmem:[#allocation2 + $0x38] sm:$0xff] %v1153_v45 }
 0x345   : > { %v1162_v48 = vadd.f32 %v1003_v47, %v777_v44  ;;  %v1005_v49 = vpop.f32.mrb[9].mxu1  ;;  %v799_v47 = vld [vmem:[#allocation2 + $0x130] sm:$0xff] }
 0x346   : > { %v1163_v50 = vadd.f32 %v1005_v49, %v778_v46 }
 0x347   : > { %1226 = vst [vmem:[#allocation2 + $0x80] sm:$0xff] %v1162_v48  ;;  %v800_v48 = vld [vmem:[#allocation2 + $0x138] sm:$0xff] }
 0x348   : > { %1227 = vst [vmem:[#allocation2 + $0x88] sm:$0xff] %v1163_v50  ;;  %v1009_v53 = vpop.f32.mrb[10].mxu1 }
 0x349   : > { %v1164_v54 = vadd.f32 %v1009_v53, %v779_v51  ;;  %v1011_v55 = vpop.f32.mrb[11].mxu1  ;;  %v801_v53 = vld [vmem:[#allocation2 + $0x140] sm:$0xff] }
 0x34a   : > { %v1165_v56 = vadd.f32 %v1011_v55, %v780_v52 }
 0x34b   : > { %1228 = vst [vmem:[#allocation2 + $0x90] sm:$0xff] %v1164_v54  ;;  %v802_v54 = vld [vmem:[#allocation2 + $0x148] sm:$0xff] }
 0x34c   : > { %1229 = vst [vmem:[#allocation2 + $0x98] sm:$0xff] %v1165_v56  ;;  %v1015_v59 = vpop.f32.mrb[12].mxu1 }
 0x34d   : > { %v1166_v60 = vadd.f32 %v1015_v59, %v781_v57  ;;  %v1017_v61 = vpop.f32.mrb[13].mxu1  ;;  %v803_v59 = vld [vmem:[#allocation2 + $0x150] sm:$0xff] }
 0x34e   : > { %v1167_v62 = vadd.f32 %v1017_v61, %v782_v58 }
 0x34f   : > { %1230 = vst [vmem:[#allocation2 + $0xa0] sm:$0xff] %v1166_v60  ;;  %v804_v60 = vld [vmem:[#allocation2 + $0x158] sm:$0xff] }
 0x350   : > { %1231 = vst [vmem:[#allocation2 + $0xa8] sm:$0xff] %v1167_v62  ;;  %v1021_v25 = vpop.f32.mrb[14].mxu1 }
 0x351   : > { %v1168_v1 = vadd.f32 %v1021_v25, %v783_v63  ;;  %v1023_v27 = vpop.f32.mrb[15].mxu1  ;;  %v805_v25 = vld [vmem:[#allocation2 + $0x160] sm:$0xff] }
 0x352   : > { %v1169_v2 = vadd.f32 %v1023_v27, %v784_v0 }
 0x353   : > { %1232 = vst [vmem:[#allocation2 + $0xb0] sm:$0xff] %v1168_v1  ;;  %v806_v1 = vld [vmem:[#allocation2 + $0x168] sm:$0xff] }
 0x354   : > { %1233 = vst [vmem:[#allocation2 + $0xb8] sm:$0xff] %v1169_v2  ;;  %v1027_v5 = vpop.f32.mrb[16].mxu1 }
 0x355   : > { %v1170_v6 = vadd.f32 %v1027_v5, %v785_v3  ;;  %v1029_v7 = vpop.f32.mrb[17].mxu1  ;;  %v807_v5 = vld [vmem:[#allocation2 + $0x170] sm:$0xff] }
 0x356   : > { %v1171_v9 = vadd.f32 %v1029_v7, %v786_v4 }
 0x357   : > { %1234 = vst [vmem:[#allocation2 + $0xc0] sm:$0xff] %v1170_v6  ;;  %v808_v6 = vld [vmem:[#allocation2 + $0x178] sm:$0xff] }
 0x358   : > { %1235 = vst [vmem:[#allocation2 + $0xc8] sm:$0xff] %v1171_v9  ;;  %v1033_v12 = vpop.f32.mrb[18].mxu1 }
 0x359   : > { %v1172_v13 = vadd.f32 %v1033_v12, %v787_v10  ;;  %v1035_v14 = vpop.f32.mrb[19].mxu1  ;;  %v809_v12 = vld [vmem:[#allocation2 + $0x180] sm:$0xff] }
 0x35a   : > { %v1173_v15 = vadd.f32 %v1035_v14, %v788_v11 }
 0x35b   : > { %1236 = vst [vmem:[#allocation2 + $0xd0] sm:$0xff] %v1172_v13  ;;  %v810_v13 = vld [vmem:[#allocation2 + $0x188] sm:$0xff] }
 0x35c   : > { %1237 = vst [vmem:[#allocation2 + $0xd8] sm:$0xff] %v1173_v15  ;;  %v1039_v18 = vpop.f32.mrb[20].mxu1 }
 0x35d   : > { %v1174_v19 = vadd.f32 %v1039_v18, %v789_v16  ;;  %v1041_v20 = vpop.f32.mrb[21].mxu1  ;;  %v811_v18 = vld [vmem:[#allocation2 + $0x190] sm:$0xff] }
 0x35e   : > { %v1175_v21 = vadd.f32 %v1041_v20, %v790_v17 }
 0x35f   : > { %1238 = vst [vmem:[#allocation2 + $0xe0] sm:$0xff] %v1174_v19  ;;  %v812_v19 = vld [vmem:[#allocation2 + $0x198] sm:$0xff] }
 0x360   : > { %1239 = vst [vmem:[#allocation2 + $0xe8] sm:$0xff] %v1175_v21  ;;  %v1045_v24 = vpop.f32.mrb[22].mxu1 }
 0x361   : > { %v1176_v26 = vadd.f32 %v1045_v24, %v791_v22  ;;  %v1047_v28 = vpop.f32.mrb[23].mxu1  ;;  %v813_v24 = vld [vmem:[#allocation2 + $0x1a0] sm:$0xff] }
 0x362   : > { %v1177_v29 = vadd.f32 %v1047_v28, %v792_v23 }
 0x363   : > { %1240 = vst [vmem:[#allocation2 + $0xf0] sm:$0xff] %v1176_v26  ;;  %v814_v26 = vld [vmem:[#allocation2 + $0x1a8] sm:$0xff] }
 0x364   : > { %1241 = vst [vmem:[#allocation2 + $0xf8] sm:$0xff] %v1177_v29  ;;  %v1051_v31 = vpop.f32.mrb[24].mxu1 }
 0x365   : > { %v1178_v32 = vadd.f32 %v1051_v31, %v793_v8  ;;  %v1053_v33 = vpop.f32.mrb[25].mxu1  ;;  %v815_v31 = vld [vmem:[#allocation2 + $0x1b0] sm:$0xff] }
 0x366   : > { %v1179_v34 = vadd.f32 %v1053_v33, %v794_v30 }
 0x367   : > { %1242 = vst [vmem:[#allocation2 + $0x100] sm:$0xff] %v1178_v32  ;;  %v816_v32 = vld [vmem:[#allocation2 + $0x1b8] sm:$0xff] }
 0x368   : > { %1243 = vst [vmem:[#allocation2 + $0x108] sm:$0xff] %v1179_v34  ;;  %v1057_v37 = vpop.f32.mrb[26].mxu1 }
 0x369   : > { %v1180_v38 = vadd.f32 %v1057_v37, %v795_v35  ;;  %v1059_v39 = vpop.f32.mrb[27].mxu1  ;;  %v817_v37 = vld [vmem:[#allocation2 + $0x1c0] sm:$0xff] }
 0x36a   : > { %v1181_v40 = vadd.f32 %v1059_v39, %v796_v36 }
 0x36b   : > { %1244 = vst [vmem:[#allocation2 + $0x110] sm:$0xff] %v1180_v38  ;;  %v818_v38 = vld [vmem:[#allocation2 + $0x1c8] sm:$0xff] }
 0x36c   : > { %1245 = vst [vmem:[#allocation2 + $0x118] sm:$0xff] %v1181_v40  ;;  %v1063_v43 = vpop.f32.mrb[28].mxu1 }
 0x36d   : > { %v1182_v44 = vadd.f32 %v1063_v43, %v797_v41  ;;  %v1065_v45 = vpop.f32.mrb[29].mxu1  ;;  %v819_v43 = vld [vmem:[#allocation2 + $0x1d0] sm:$0xff] }
 0x36e   : > { %v1183_v46 = vadd.f32 %v1065_v45, %v798_v42 }
 0x36f   : > { %1246 = vst [vmem:[#allocation2 + $0x120] sm:$0xff] %v1182_v44  ;;  %v820_v44 = vld [vmem:[#allocation2 + $0x1d8] sm:$0xff] }
 0x370   : > { %1247 = vst [vmem:[#allocation2 + $0x128] sm:$0xff] %v1183_v46  ;;  %v1069_v49 = vpop.f32.mrb[30].mxu1 }
 0x371   : > { %v1184_v50 = vadd.f32 %v1069_v49, %v799_v47  ;;  %v1071_v51 = vpop.f32.mrb[31].mxu1  ;;  %v821_v49 = vld [vmem:[#allocation2 + $0x1e0] sm:$0xff] }
 0x372   : > { %v1185_v52 = vadd.f32 %v1071_v51, %v800_v48 }
 0x373   : > { %1248 = vst [vmem:[#allocation2 + $0x130] sm:$0xff] %v1184_v50  ;;  %v822_v50 = vld [vmem:[#allocation2 + $0x1e8] sm:$0xff] }
 0x374   : > { %1249 = vst [vmem:[#allocation2 + $0x138] sm:$0xff] %v1185_v52  ;;  %v1075_v55 = vpop.f32.mrb[32].mxu1 }
 0x375   : > { %v1186_v56 = vadd.f32 %v1075_v55, %v801_v53  ;;  %v1077_v57 = vpop.f32.mrb[33].mxu1  ;;  %v823_v55 = vld [vmem:[#allocation2 + $0x1f0] sm:$0xff] }
 0x376   : > { %v1187_v58 = vadd.f32 %v1077_v57, %v802_v54 }
 0x377   : > { %1250 = vst [vmem:[#allocation2 + $0x140] sm:$0xff] %v1186_v56  ;;  %v824_v56 = vld [vmem:[#allocation2 + $0x1f8] sm:$0xff] }
 0x378   : > { %1251 = vst [vmem:[#allocation2 + $0x148] sm:$0xff] %v1187_v58  ;;  %v1081_v61 = vpop.f32.mrb[34].mxu1 }
 0x379   : > { %v1188_v62 = vadd.f32 %v1081_v61, %v803_v59  ;;  %v1083_v63 = vpop.f32.mrb[35].mxu1  ;;  %v1598_v61 = vld [vmem:[#allocation9] sm:$0xff] (!%p2042_p4) }
 0x37a   : > { %v1189_v0 = vadd.f32 %v1083_v63, %v804_v60  ;;  %v1600_v63 = vld [vmem:[#allocation9 + $0x10] sm:$0xff] (!%p2042_p4) }
 0x37b   : > { %1252 = vst [vmem:[#allocation2 + $0x150] sm:$0xff] %v1188_v62  ;;  %v1599_v62 = vld [vmem:[#allocation9 + $0x8] sm:$0xff] (!%p2042_p4) }
 0x37c   : > { %1253 = vst [vmem:[#allocation2 + $0x158] sm:$0xff] %v1189_v0  ;;  %v1087_v27 = vpop.f32.mrb[36].mxu1  ;;  %v2276_v0 = vpack.c.bf16 (!%p2042_p4), %v1599_v62, %v1598_v61 }
 0x37d   : > { %v1190_v2 = vadd.f32 %v1087_v27, %v805_v25  ;;  %v1089_v3 = vpop.f32.mrb[37].mxu1  ;;  %v1601_v25 = vld [vmem:[#allocation9 + $0x18] sm:$0xff] (!%p2042_p4)  ;;  %v1602_v27 = vld [vmem:[#allocation9 + $0x20] sm:$0xff] (!%p2042_p4) }
 0x37e   : > { %v1191_v4 = vadd.f32 %v1089_v3, %v806_v1  ;;  %v2280_v1 = vpack.c.bf16 (!%p2042_p4), %v1601_v25, %v1600_v63  ;;  %2277 = vmatprep.subr.bf16.mxu0 (!%p2042_p4), %v2276_v0  ;;  %2340 = vmatprep.subr.bf16.mxu1 (!%p2042_p4), %v2276_v0 }
 0x37f   : > { %1254 = vst [vmem:[#allocation2 + $0x160] sm:$0xff] %v1190_v2  ;;  %v1603_v2 = vld [vmem:[#allocation9 + $0x28] sm:$0xff] (!%p2042_p4)  ;;  %2279 = vmatpush3.bf16.msra.mxu0 (!%p2042_p4), %v2276_v0  ;;  %2348 = vmatpush3.bf16.msra.mxu1 (!%p2042_p4), %v2276_v0 }
 0x380   : > { %1255 = vst [vmem:[#allocation2 + $0x168] sm:$0xff] %v1191_v4  ;;  %v1093_v7 = vpop.f32.mrb[38].mxu1  ;;  %2281 = vmatprep.subr.bf16.mxu0 (!%p2042_p4), %v2280_v1  ;;  %2341 = vmatprep.subr.bf16.mxu1 (!%p2042_p4), %v2280_v1  ;;  %v2284_v3 = vpack.c.bf16 (!%p2042_p4), %v1603_v2, %v1602_v27  ;;  %v1604_v4 = vld [vmem:[#allocation9 + $0x30] sm:$0xff] (!%p2042_p4)  ;;  %v1289_v27 = vld [vmem:[#allocation2 + $0x58] sm:$0xff] (!%p2042_p4) }
 0x381   : > { %v1192_v9 = vadd.f32 %v1093_v7, %v807_v5  ;;  %v1095_v10 = vpop.f32.mrb[39].mxu1  ;;  %v1278_v5 = vld [vmem:[#allocation2] sm:$0xff] (!%p2042_p4)  ;;  %v1605_v7 = vld [vmem:[#allocation9 + $0x38] sm:$0xff] (!%p2042_p4) }
 0x382   : > { %v1193_v11 = vadd.f32 %v1095_v10, %v808_v6  ;;  %v1279_v6 = vld [vmem:[#allocation2 + $0x8] sm:$0xff] (!%p2042_p4)  ;;  %v1310_v10 = vld [vmem:[#allocation2 + $0x100] sm:$0xff] (!%p2042_p4)  ;;  %2517 = vtanh.f32 (!%p2042_p4), %v1278_v5 }
 0x383   : > { %1256 = vst [vmem:[#allocation2 + $0x170] sm:$0xff] %v1192_v9  ;;  %v1374_v9 = vsub.f32 (!%p2042_p4), 0.0, %v1279_v6  ;;  %2283 = vmatpush3.bf16.msra.mxu0 (!%p2042_p4), %v2280_v1  ;;  %2349 = vmatpush3.bf16.msra.mxu1 (!%p2042_p4), %v2280_v1  ;;  %2519 = vtanh.f32 (!%p2042_p4), %v1310_v10  ;;  %v1316_v6 = vld [vmem:[#allocation2 + $0x130] sm:$0xff] (!%p2042_p4) }
 0x384   : > { %1257 = vst [vmem:[#allocation2 + $0x178] sm:$0xff] %v1193_v11  ;;  %v1099_v14 = vpop.f32.mrb[40].mxu1  ;;  %v1311_v11 = vld [vmem:[#allocation2 + $0x108] sm:$0xff] (!%p2042_p4)  ;;  %2285 = vmatprep.subr.bf16.mxu0 (!%p2042_p4), %v2284_v3  ;;  %2342 = vmatprep.subr.bf16.mxu1 (!%p2042_p4), %v2284_v3 }
 0x385   : > { %v1194_v15 = vadd.f32 %v1099_v14, %v809_v12  ;;  %v1101_v16 = vpop.f32.mrb[41].mxu1  ;;  %v1390_v12 = vsub.f32 (!%p2042_p4), 0.0, %v1311_v11  ;;  %v1313_v14 = vld [vmem:[#allocation2 + $0x118] sm:$0xff] (!%p2042_p4)  ;;  %v1379_v11 = vsub.f32 (!%p2042_p4), 0.0, %v1289_v27 }
 0x386   : > { %v1195_v17 = vadd.f32 %v1101_v16, %v810_v13  ;;  %v1281_v13 = vld [vmem:[#allocation2 + $0x18] sm:$0xff] (!%p2042_p4) }
 0x387   : > { %1258 = vst [vmem:[#allocation2 + $0x180] sm:$0xff] %v1194_v15  ;;  %v1406_v15 = vmul.f32 (!%p2042_p4), 1.442695, %v1374_v9  ;;  %v1375_v16 = vsub.f32 (!%p2042_p4), 0.0, %v1281_v13  ;;  %2287 = vmatpush3.bf16.msra.mxu0 (!%p2042_p4), %v2284_v3  ;;  %2350 = vmatpush3.bf16.msra.mxu1 (!%p2042_p4), %v2284_v3 }
 0x388   : > { %1259 = vst [vmem:[#allocation2 + $0x188] sm:$0xff] %v1195_v17  ;;  %v1105_v20 = vpop.f32.mrb[42].mxu1  ;;  %v1391_v17 = vsub.f32 (!%p2042_p4), 0.0, %v1313_v14  ;;  %v1291_v14 = vld [vmem:[#allocation2 + $0x68] sm:$0xff] (!%p2042_p4) }
 0x389   : > { %v1196_v21 = vadd.f32 %v1105_v20, %v811_v18  ;;  %v1107_v22 = vpop.f32.mrb[43].mxu1  ;;  %v1283_v18 = vld [vmem:[#allocation2 + $0x28] sm:$0xff] (!%p2042_p4)  ;;  %v1606_v20 = vld [vmem:[#allocation9 + $0x40] sm:$0xff] (!%p2042_p4)  ;;  %2521 = vpow2.f32 (!%p2042_p4), %v1406_v15 }
 0x38a   : > { %v1197_v23 = vadd.f32 %v1107_v22, %v812_v19  ;;  %v2288_v19 = vpack.c.bf16 (!%p2042_p4), %v1605_v7, %v1604_v4  ;;  %v1438_v22 = vmul.f32 (!%p2042_p4), 1.442695, %v1390_v12  ;;  %v1321_v7 = vld [vmem:[#allocation2 + $0x158] sm:$0xff] (!%p2042_p4) }
 0x38b   : > { %1260 = vst [vmem:[#allocation2 + $0x190] sm:$0xff] %v1196_v21  ;;  %v1607_v21 = vld [vmem:[#allocation9 + $0x48] sm:$0xff] (!%p2042_p4) }
 0x38c   : > { %1261 = vst [vmem:[#allocation2 + $0x198] sm:$0xff] %v1197_v23  ;;  %v1111_v28 = vpop.f32.mrb[44].mxu1  ;;  %v1376_v23 = vsub.f32 (!%p2042_p4), 0.0, %v1283_v18  ;;  %2523 = vpow2.f32 (!%p2042_p4), %v1438_v22  ;;  %2289 = vmatprep.subr.bf16.mxu0 (!%p2042_p4), %v2288_v19  ;;  %2343 = vmatprep.subr.bf16.mxu1 (!%p2042_p4), %v2288_v19  ;;  %v1323_v22 = vld [vmem:[#allocation2 + $0x168] sm:$0xff] (!%p2042_p4) }
 0x38d   : > { %v1198_v29 = vadd.f32 %v1111_v28, %v813_v24  ;;  %v1113_v8 = vpop.f32.mrb[45].mxu1  ;;  %v1315_v24 = vld [vmem:[#allocation2 + $0x128] sm:$0xff] (!%p2042_p4)  ;;  %v1440_v28 = vmul.f32 (!%p2042_p4), 1.442695, %v1391_v17  ;;  %2291 = vmatpush3.bf16.msra.mxu0 (!%p2042_p4), %v2288_v19  ;;  %2351 = vmatpush3.bf16.msra.mxu1 (!%p2042_p4), %v2288_v19 }
 0x38e   : > { %v1199_v30 = vadd.f32 %v1113_v8, %v814_v26  ;;  %v1408_v26 = vmul.f32 (!%p2042_p4), 1.442695, %v1375_v16  ;;  %v1285_v8 = vld [vmem:[#allocation2 + $0x38] sm:$0xff] (!%p2042_p4)  ;;  %v1395_v16 = vsub.f32 (!%p2042_p4), 0.0, %v1321_v7 }
 0x38f   : > { %1262 = vst [vmem:[#allocation2 + $0x1a0] sm:$0xff] %v1198_v29  ;;  %v1392_v29 = vsub.f32 (!%p2042_p4), 0.0, %v1315_v24 }
 0x390   : > { %1263 = vst [vmem:[#allocation2 + $0x1a8] sm:$0xff] %v1199_v30  ;;  %v1117_v33 = vpop.f32.mrb[46].mxu1  ;;  %v1280_v30 = vld [vmem:[#allocation2 + $0x10] sm:$0xff] (!%p2042_p4)  ;;  %2525 = vpow2.f32 (!%p2042_p4), %v1408_v26 }
 0x391   : > { %v1200_v34 = vadd.f32 %v1117_v33, %v815_v31  ;;  %v1119_v35 = vpop.f32.mrb[47].mxu1  ;;  %v1410_v31 = vmul.f32 (!%p2042_p4), 1.442695, %v1376_v23  ;;  %v1317_v33 = vld [vmem:[#allocation2 + $0x138] sm:$0xff] (!%p2042_p4)  ;;  %2527 = vpow2.f32 (!%p2042_p4), %v1440_v28  ;;  %v1286_v28 = vld [vmem:[#allocation2 + $0x40] sm:$0xff] (!%p2042_p4) }
 0x392   : > { %v1201_v36 = vadd.f32 %v1119_v35, %v816_v32  ;;  %v1377_v32 = vsub.f32 (!%p2042_p4), 0.0, %v1285_v8  ;;  %v1312_v35 = vld [vmem:[#allocation2 + $0x110] sm:$0xff] (!%p2042_p4)  ;;  %2529 = vtanh.f32 (!%p2042_p4), %v1280_v30 }
 0x393   : > { %1264 = vst [vmem:[#allocation2 + $0x1b0] sm:$0xff] %v1200_v34  ;;  %v2292_v34 = vpack.c.bf16 (!%p2042_p4), %v1607_v21, %v1606_v20  ;;  %2531 = vpow2.f32 (!%p2042_p4), %v1410_v31  ;;  %v1416_v20 = vmul.f32 (!%p2042_p4), 1.442695, %v1379_v11  ;;  %v1380_v21 = vsub.f32 (!%p2042_p4), 0.0, %v1291_v14  ;;  %v1292_v14 = vld [vmem:[#allocation2 + $0x70] sm:$0xff] (!%p2042_p4) }
 0x394   : > { %1265 = vst [vmem:[#allocation2 + $0x1b8] sm:$0xff] %v1201_v36  ;;  %v1123_v39 = vpop.f32.mrb[48].mxu1  ;;  %v1442_v36 = vmul.f32 (!%p2042_p4), 1.442695, %v1392_v29  ;;  %2533 = vtanh.f32 (!%p2042_p4), %v1312_v35  ;;  %v1448_v29 = vmul.f32 (!%p2042_p4), 1.442695, %v1395_v16 }
 0x395   : > { %v1202_v40 = vadd.f32 %v1123_v39, %v817_v37  ;;  %v1125_v41 = vpop.f32.mrb[49].mxu1  ;;  %v1393_v37 = vsub.f32 (!%p2042_p4), 0.0, %v1317_v33  ;;  %v1609_v39 = vld [vmem:[#allocation9 + $0x58] sm:$0xff] (!%p2042_p4)  ;;  %2293 = vmatprep.subr.bf16.mxu0 (!%p2042_p4), %v2292_v34  ;;  %2344 = vmatprep.subr.bf16.mxu1 (!%p2042_p4), %v2292_v34  ;;  %v1396_v31 = vsub.f32 (!%p2042_p4), 0.0, %v1323_v22  ;;  %v1318_v35 = vld [vmem:[#allocation2 + $0x140] sm:$0xff] (!%p2042_p4) }
 0x396   : > { %v1203_v42 = vadd.f32 %v1125_v41, %v818_v38  ;;  %v1608_v38 = vld [vmem:[#allocation9 + $0x50] sm:$0xff] (!%p2042_p4)  ;;  %v1412_v41 = vmul.f32 (!%p2042_p4), 1.442695, %v1377_v32  ;;  %2535 = vpow2.f32 (!%p2042_p4), %v1442_v36  ;;  %2295 = vmatpush3.bf16.msra.mxu0 (!%p2042_p4), %v2292_v34  ;;  %2352 = vmatpush3.bf16.msra.mxu1 (!%p2042_p4), %v2292_v34  ;;  %v1293_v32 = vld [vmem:[#allocation2 + $0x78] sm:$0xff] (!%p2042_p4)  ;;  %v1418_v36 = vmul.f32 (!%p2042_p4), 1.442695, %v1380_v21 }
 0x397   : > { %1266 = vst [vmem:[#allocation2 + $0x1c0] sm:$0xff] %v1202_v40  ;;  %v1282_v40 = vld [vmem:[#allocation2 + $0x20] sm:$0xff] (!%p2042_p4)  ;;  %v1329_v16 = vld [vmem:[#allocation2 + $0x198] sm:$0xff] (!%p2042_p4) }
 0x398   : > { %1267 = vst [vmem:[#allocation2 + $0x1c8] sm:$0xff] %v1203_v42  ;;  %v1129_v45 = vpop.f32.mrb[50].mxu1  ;;  %v1287_v42 = vld [vmem:[#allocation2 + $0x48] sm:$0xff] (!%p2042_p4)  ;;  %2537 = vtanh.f32 (!%p2042_p4), %v1282_v40 }
 0x399   : > { %v1204_v46 = vadd.f32 %v1129_v45, %v819_v43  ;;  %v1131_v47 = vpop.f32.mrb[51].mxu1  ;;  %v2296_v43 = vpack.c.bf16 (!%p2042_p4), %v1609_v39, %v1608_v38  ;;  %v1444_v45 = vmul.f32 (!%p2042_p4), 1.442695, %v1393_v37  ;;  %2539 = vpow2.f32 (!%p2042_p4), %v1412_v41  ;;  %v1325_v39 = vld [vmem:[#allocation2 + $0x178] sm:$0xff] (!%p2042_p4) }
 0x39a   : > { %v1205_v48 = vadd.f32 %v1131_v47, %v820_v44  ;;  %v1314_v44 = vld [vmem:[#allocation2 + $0x120] sm:$0xff] (!%p2042_p4) }
 0x39b   : > { %1268 = vst [vmem:[#allocation2 + $0x1d0] sm:$0xff] %v1204_v46  ;;  %v3633_v46 = vpop.eup (!%p2042_p4), %2517  ;;  %v1610_v47 = vld [vmem:[#allocation9 + $0x60] sm:$0xff] (!%p2042_p4)  ;;  %2541 = vtanh.f32 (!%p2042_p4), %v1314_v44  ;;  %2297 = vmatprep.subr.bf16.mxu0 (!%p2042_p4), %v2296_v43  ;;  %2345 = vmatprep.subr.bf16.mxu1 (!%p2042_p4), %v2296_v43 }
 0x39c   : > { %1269 = vst [vmem:[#allocation2 + $0x1d8] sm:$0xff] %v1205_v48  ;;  %v1135_v51 = vpop.f32.mrb[52].mxu1  ;;  %v1611_v48 = vld [vmem:[#allocation9 + $0x68] sm:$0xff] (!%p2042_p4)  ;;  %2543 = vpow2.f32 (!%p2042_p4), %v1444_v45  ;;  %2299 = vmatpush3.bf16.msra.mxu0 (!%p2042_p4), %v2296_v43  ;;  %2353 = vmatpush3.bf16.msra.mxu1 (!%p2042_p4), %v2296_v43  ;;  %v1288_v45 = vld [vmem:[#allocation2 + $0x50] sm:$0xff] (!%p2042_p4) }
 0x39d   : > { %v1206_v52 = vadd.f32 %v1135_v51, %v821_v49  ;;  %v1137_v53 = vpop.f32.mrb[53].mxu1  ;;  %v3635_v49 = vpop.eup (!%p2042_p4), %2519  ;;  %v1378_v51 = vsub.f32 (!%p2042_p4), 0.0, %v1287_v42  ;;  %v1381_v42 = vsub.f32 (!%p2042_p4), 0.0, %v1293_v32 }
 0x39e   : > { %v1207_v54 = vadd.f32 %v1137_v53, %v822_v50  ;;  %1277 = sbr.rel (%p2042_p4) target bundleno = 1248 (0x4e0), region = 68  ;;  %v1284_v50 = vld [vmem:[#allocation2 + $0x30] sm:$0xff] (!%p2042_p4)  ;;  %v1319_v53 = vld [vmem:[#allocation2 + $0x148] sm:$0xff] (!%p2042_p4) }
 0x39f   : > { %1270 = vst [vmem:[#allocation2 + $0x1e0] sm:$0xff] %v1206_v52  ;;  %v2522_v52 = vpop.eup (!%p2042_p4), %2521  ;;  %2545 = vtanh.f32 (!%p2042_p4), %v1284_v50  ;;  %v1414_v63 = vmul.f32 (!%p2042_p4), 1.442695, %v1378_v51  ;;  %v1394_v0 = vsub.f32 (!%p2042_p4), 0.0, %v1319_v53  ;;  %v1320_v51 = vld [vmem:[#allocation2 + $0x150] sm:$0xff] (!%p2042_p4) }
 0x3a0   : > { %1271 = vst [vmem:[#allocation2 + $0x1e8] sm:$0xff] %v1207_v54  ;;  %v1141_v57 = vpop.f32.mrb[54].mxu1  ;;  %v2524_v54 = vpop.eup (!%p2042_p4), %2523 }
 0x3a1   : > { %v1208_v58 = vadd.f32 %v1141_v57, %v823_v55  ;;  %v1143_v59 = vpop.f32.mrb[55].mxu1  ;;  %v2300_v55 = vpack.c.bf16 (!%p2042_p4), %v1611_v48, %v1610_v47  ;;  %v2526_v57 = vpop.eup (!%p2042_p4), %2525  ;;  %v1446_v10 = vmul.f32 (!%p2042_p4), 1.442695, %v1394_v0 }
 0x3a2   : > { %v1209_v60 = vadd.f32 %v1143_v59, %v824_v56  ;;  %v1470_v56 = vadd.f32 (!%p2042_p4), 1.0, %v2522_v52  ;;  %v1613_v59 = vld [vmem:[#allocation9 + $0x78] sm:$0xff] (!%p2042_p4)  ;;  %v2528_v61 = vpop.eup (!%p2042_p4), %2527  ;;  %v1471_v62 = vadd.f32 (!%p2042_p4), 1.0, %v2526_v57  ;;  %v1295_v52 = vld [vmem:[#allocation2 + $0x88] sm:$0xff] (!%p2042_p4) }
 0x3a3   : > { %1272 = vst [vmem:[#allocation2 + $0x1f0] sm:$0xff] %v1208_v58  ;;  %v1612_v58 = vld [vmem:[#allocation9 + $0x70] sm:$0xff] (!%p2042_p4)  ;;  %v2530_v25 = vpop.eup (!%p2042_p4), %2529  ;;  %v1487_v1 = vadd.f32 (!%p2042_p4), 1.0, %v2528_v61  ;;  %2301 = vmatprep.subr.bf16.mxu0 (!%p2042_p4), %v2300_v55  ;;  %2346 = vmatprep.subr.bf16.mxu1 (!%p2042_p4), %v2300_v55  ;;  %v1382_v61 = vsub.f32 (!%p2042_p4), 0.0, %v1295_v52 }
 0x3a4   : > { %1273 = vst [vmem:[#allocation2 + $0x1f8] sm:$0xff] %v1209_v60  ;;  %v1486_v60 = vadd.f32 (!%p2042_p4), 1.0, %v2524_v54  ;;  %2547 = vrcp.f32 (!%p2042_p4), %v1470_v56  ;;  %v2532_v2 = vpop.eup (!%p2042_p4), %2531  ;;  %v2304_v3 = vpack.c.bf16 (!%p2042_p4), %v1613_v59, %v1612_v58  ;;  %2303 = vmatpush3.bf16.msra.mxu0 (!%p2042_p4), %v2300_v55  ;;  %2354 = vmatpush3.bf16.msra.mxu1 (!%p2042_p4), %v2300_v55  ;;  %v1420_v55 = vmul.f32 (!%p2042_p4), 1.442695, %v1381_v42  ;;  %v1290_v59 = vld [vmem:[#allocation2 + $0x60] sm:$0xff] (!%p2042_p4) }
 0x3a5   : > { %v2534_v4 = vpop.eup %2533  ;;  %v1472_v5 = vadd.f32 1.0, %v2532_v2  ;;  %v1322_v2 = vld [vmem:[#allocation2 + $0x160] sm:$0xff] }
 0x3a6   : > { %2549 = vrcp.f32 %v1486_v60  ;;  %v2536_v9 = vpop.eup %2535  ;;  %2305 = vmatprep.subr.bf16.mxu0 %v2304_v3  ;;  %2347 = vmatprep.subr.bf16.mxu1 %v2304_v3  ;;  %v1294_v42 = vld [vmem:[#allocation2 + $0x80] sm:$0xff] }
 0x3a7   : > { %2551 = vrcp.f32 %v1471_v62  ;;  %v2538_v12 = vpop.eup %2537  ;;  %v1488_v13 = vadd.f32 1.0, %v2536_v9  ;;  %v1327_v62 = vld [vmem:[#allocation2 + $0x188] sm:$0xff] }
 0x3a8   : > { %2553 = vrcp.f32 %v1487_v1  ;;  %v2540_v15 = vpop.eup %2539  ;;  %2307 = vmatpush3.bf16.msra.mxu0 %v2304_v3  ;;  %2355 = vmatpush3.bf16.msra.mxu1 %v2304_v3  ;;  %v1398_v3 = vsub.f32 0.0, %v1327_v62 }
 0x3a9   : > { %2555 = vpow2.f32 %v1414_v63  ;;  %v2542_v17 = vpop.eup %2541  ;;  %v1473_v18 = vadd.f32 1.0, %v2540_v15 }
 0x3aa   : > { %2557 = vrcp.f32 %v1472_v5  ;;  %v2544_v19 = vpop.eup %2543  ;;  %v1454_v15 = vmul.f32 1.442695, %v1398_v3  ;;  %v1328_v3 = vld [vmem:[#allocation2 + $0x190] sm:$0xff] }
 0x3ab   : > { %2559 = vtanh.f32 %v1316_v6  ;;  %v2546_v23 = vpop.eup %2545  ;;  %v1489_v24 = vadd.f32 1.0, %v2544_v19  ;;  %v1422_v6 = vmul.f32 1.442695, %v1382_v61 }
 0x3ac   : > { %2561 = vrcp.f32 %v1488_v13 }
 0x3ad   : > { %2563 = vpow2.f32 %v1446_v10 }
 0x3ae   : > { %2565 = vrcp.f32 %v1473_v18  ;;  %v2548_v26 = vpop.eup %2547 }
 0x3af   : > { %v1566_v30 = vmul.f32 %v2548_v26, %v3633_v46  ;;  %2567 = vrcp.f32 %v1489_v24  ;;  %v1450_v46 = vmul.f32 1.442695, %v1396_v31  ;;  %v1399_v26 = vsub.f32 0.0, %v1329_v16  ;;  %v1331_v31 = vld [vmem:[#allocation2 + $0x1a8] sm:$0xff] }
 0x3b0   : > { %v2550_v8 = vpop.eup %2549  ;;  %2569 = vpow2.f32 %v1416_v20  ;;  %v1299_v20 = vld [vmem:[#allocation2 + $0xa8] sm:$0xff] }
 0x3b1   : > { %v2552_v33 = vpop.eup %2551  ;;  %v1582_v34 = vmul.f32 %v2550_v8, %v3635_v49  ;;  %2132 = vmatprep.mubr.f32.mxu0 %v1566_v30  ;;  %2571 = vtanh.f32 %v1286_v28  ;;  %v1397_v49 = vsub.f32 0.0, %v1325_v39  ;;  %v1384_v30 = vsub.f32 0.0, %v1299_v20  ;;  %v1301_v39 = vld [vmem:[#allocation2 + $0xb8] sm:$0xff] }
 0x3b2   : > { %v2554_v37 = vpop.eup %2553  ;;  %v1567_v38 = vmul.f32 %v2552_v33, %v2530_v25  ;;  %2573 = vpow2.f32 %v1448_v29 }
 0x3b3   : > { %v2556_v40 = vpop.eup %2555  ;;  %2156 = vmatprep.mubr.f32.mxu1 %v1582_v34  ;;  %v1583_v41 = vmul.f32 %v2554_v37, %v2534_v4  ;;  %2575 = vtanh.f32 %v1318_v35  ;;  %v1452_v60 = vmul.f32 1.442695, %v1397_v49  ;;  %v1297_v4 = vld [vmem:[#allocation2 + $0x98] sm:$0xff]  ;;  %v1456_v35 = vmul.f32 1.442695, %v1399_v26 }
 0x3b4   : > { %v2558_v43 = vpop.eup %2557  ;;  %2133 = vmatmul.mubr.f32.vlgmr.msra.gmra.mrb[0].mxu0 %v1567_v38  ;;  %v1474_v44 = vadd.f32 1.0, %v2556_v40  ;;  %2577 = vpow2.f32 %v1418_v36  ;;  %v1383_v11 = vsub.f32 0.0, %v1297_v4  ;;  %v1400_v38 = vsub.f32 0.0, %v1331_v31  ;;  %v1300_v31 = vld [vmem:[#allocation2 + $0xb0] sm:$0xff] }
 0x3b5   : > { %v2560_v47 = vpop.eup %2559  ;;  %2157 = vmatmul.mubr.f32.vlgmr.msra.gmra.mrb[0].mxu1 %v1583_v41  ;;  %v1568_v48 = vmul.f32 %v2558_v43, %v2538_v12  ;;  %v1426_v43 = vmul.f32 1.442695, %v1384_v30 }
 0x3b6   : > { %v2562_v50 = vpop.eup %2561  ;;  %2579 = vrcp.f32 %v1474_v44  ;;  %v1424_v24 = vmul.f32 1.442695, %v1383_v11  ;;  %v1458_v52 = vmul.f32 1.442695, %v1400_v38 }
 0x3b7   : > { %v2564_v53 = vpop.eup %2563  ;;  %2135 = vmatprep.mubr.f32.mxu0 %v1568_v48  ;;  %v1584_v54 = vmul.f32 %v2562_v50, %v2542_v17  ;;  %2581 = vtanh.f32 %v1288_v45  ;;  %v1333_v48 = vld [vmem:[#allocation2 + $0x1b8] sm:$0xff] }
 0x3b8   : > { %v2566_v56 = vpop.eup %2565  ;;  %v1490_v57 = vadd.f32 1.0, %v2564_v53  ;;  %2583 = vpow2.f32 %v1450_v46 }
 0x3b9   : > { %2159 = vmatprep.mubr.f32.mxu1 %v1584_v54  ;;  %v1569_v58 = vmul.f32 %v2566_v56, %v2546_v23  ;;  %2585 = vtanh.f32 %v1320_v51  ;;  %v2568_v63 = vpop.eup %2567  ;;  %v1324_v23 = vld [vmem:[#allocation2 + $0x170] sm:$0xff]  ;;  %v1326_v51 = vld [vmem:[#allocation2 + $0x180] sm:$0xff]  ;;  %v1401_v56 = vsub.f32 0.0, %v1333_v48 }
 0x3ba   : > { %2587 = vrcp.f32 %v1490_v57  ;;  %v2570_v0 = vpop.eup %2569  ;;  %v1585_v25 = vmul.f32 %v2568_v63, %v2560_v47  ;;  %v1385_v47 = vsub.f32 0.0, %v1301_v39  ;;  %v1303_v57 = vld [vmem:[#allocation2 + $0xc8] sm:$0xff] }
 0x3bb   : > { %2136 = vmatmul.mubr.f32.gmra.mrb[2].mxu0 %v1569_v58  ;;  %2589 = vpow2.f32 %v1420_v55  ;;  %v2572_v1 = vpop.eup %2571  ;;  %v1475_v27 = vadd.f32 1.0, %v2570_v0  ;;  %v1460_v4 = vmul.f32 1.442695, %v1401_v56 }
 0x3bc   : > { %2591 = vtanh.f32 %v1290_v59  ;;  %v2574_v5 = vpop.eup %2573  ;;  %2160 = vmatmul.mubr.f32.gmra.mrb[2].mxu1 %v1585_v25  ;;  %v1428_v61 = vmul.f32 1.442695, %v1385_v47  ;;  %v1386_v25 = vsub.f32 0.0, %v1303_v57 }
 0x3bd   : > { %2593 = vpow2.f32 %v1452_v60  ;;  %v2576_v7 = vpop.eup %2575  ;;  %v1491_v9 = vadd.f32 1.0, %v2574_v5  ;;  %v1296_v60 = vld [vmem:[#allocation2 + $0x90] sm:$0xff] }
 0x3be   : > { %2595 = vrcp.f32 %v1475_v27  ;;  %v2578_v10 = vpop.eup %2577 }
 0x3bf   : > { %2597 = vtanh.f32 %v1322_v2  ;;  %v1476_v13 = vadd.f32 1.0, %v2578_v10  ;;  %v1305_v10 = vld [vmem:[#allocation2 + $0xd8] sm:$0xff] }
 0x3c0   : > { %v2580_v12 = vpop.eup %2579  ;;  %2599 = vrcp.f32 %v1491_v9 }
 0x3c1   : > { %v2582_v17 = vpop.eup %2581  ;;  %v1570_v18 = vmul.f32 %v2580_v12, %v2572_v1  ;;  %2601 = vpow2.f32 %v1422_v6  ;;  %v1335_v1 = vld [vmem:[#allocation2 + $0x1c8] sm:$0xff] }
 0x3c2   : > { %v2584_v19 = vpop.eup %2583  ;;  %2603 = vrcp.f32 %v1476_v13  ;;  %v1402_v9 = vsub.f32 0.0, %v1335_v1  ;;  %v1430_v13 = vmul.f32 1.442695, %v1386_v25  ;;  %v1304_v1 = vld [vmem:[#allocation2 + $0xd0] sm:$0xff] }
 0x3c3   : > { %v2586_v21 = vpop.eup %2585  ;;  %2138 = vmatprep.mubr.f32.mxu0 %v1570_v18  ;;  %v1492_v22 = vadd.f32 1.0, %v2584_v19  ;;  %2605 = vtanh.f32 %v1292_v14  ;;  %v1337_v18 = vld [vmem:[#allocation2 + $0x1d8] sm:$0xff] }
 0x3c4   : > { %v2588_v28 = vpop.eup %2587  ;;  %2607 = vpow2.f32 %v1454_v15 }
 0x3c5   : > { %v2590_v29 = vpop.eup %2589  ;;  %v1586_v8 = vmul.f32 %v2588_v28, %v2576_v7  ;;  %2609 = vrcp.f32 %v1492_v22  ;;  %v1298_v7 = vld [vmem:[#allocation2 + $0xa0] sm:$0xff]  ;;  %v1462_v22 = vmul.f32 1.442695, %v1402_v9  ;;  %v1403_v28 = vsub.f32 0.0, %v1337_v18 }
 0x3c6   : > { %v2592_v32 = vpop.eup %2591  ;;  %v1477_v33 = vadd.f32 1.0, %v2590_v29  ;;  %2611 = vtanh.f32 %v1324_v23  ;;  %v1307_v29 = vld [vmem:[#allocation2 + $0xe8] sm:$0xff] }
 0x3c7   : > { %v2594_v34 = vpop.eup %2593  ;;  %2162 = vmatprep.mubr.f32.mxu1 %v1586_v8  ;;  %2613 = vpow2.f32 %v1424_v24 }
 0x3c8   : > { %v2596_v36 = vpop.eup %2595  ;;  %2615 = vrcp.f32 %v1477_v33  ;;  %v1493_v37 = vadd.f32 1.0, %v2594_v34 }
 0x3c9   : > { %v2598_v40 = vpop.eup %2597  ;;  %v1571_v41 = vmul.f32 %v2596_v36, %v2582_v17  ;;  %v1387_v17 = vsub.f32 0.0, %v1305_v10  ;;  %v1388_v36 = vsub.f32 0.0, %v1307_v29  ;;  %v1308_v29 = vld [vmem:[#allocation2 + $0xf0] sm:$0xff] }
 0x3ca   : > { %v2600_v44 = vpop.eup %2599  ;;  %2617 = vrcp.f32 %v1493_v37  ;;  %v1339_v37 = vld [vmem:[#allocation2 + $0x1e8] sm:$0xff] }
 0x3cb   : > { %v2602_v45 = vpop.eup %2601  ;;  %2139 = vmatmul.mubr.f32.gmra.mrb[4].mxu0 %v1571_v41  ;;  %v1587_v46 = vmul.f32 %v2600_v44, %v2586_v21  ;;  %2619 = vpow2.f32 %v1456_v35  ;;  %v1330_v21 = vld [vmem:[#allocation2 + $0x1a0] sm:$0xff]  ;;  %v1464_v41 = vmul.f32 1.442695, %v1403_v28 }
 0x3cc   : > { %v2604_v49 = vpop.eup %2603  ;;  %2621 = vtanh.f32 %v1294_v42  ;;  %v1478_v50 = vadd.f32 1.0, %v2602_v45  ;;  %v1404_v45 = vsub.f32 0.0, %v1339_v37 }
 0x3cd   : > { %v2606_v53 = vpop.eup %2605  ;;  %2163 = vmatmul.mubr.f32.gmra.mrb[4].mxu1 %v1587_v46  ;;  %v1572_v54 = vmul.f32 %v2604_v49, %v2592_v32  ;;  %2623 = vpow2.f32 %v1426_v43  ;;  %v1432_v32 = vmul.f32 1.442695, %v1387_v17  ;;  %v1309_v46 = vld [vmem:[#allocation2 + $0xf8] sm:$0xff]  ;;  %v1302_v49 = vld [vmem:[#allocation2 + $0xc0] sm:$0xff] }
 0x3ce   : > { %v2608_v55 = vpop.eup %2607  ;;  %2625 = vrcp.f32 %v1478_v50  ;;  %v1434_v50 = vmul.f32 1.442695, %v1388_v36 }
 0x3cf   : > { %v2610_v58 = vpop.eup %2609  ;;  %2141 = vmatprep.mubr.f32.mxu0 %v1572_v54  ;;  %2627 = vtanh.f32 %v1326_v51  ;;  %v1494_v59 = vadd.f32 1.0, %v2608_v55  ;;  %v1389_v54 = vsub.f32 0.0, %v1309_v46  ;;  %v1341_v55 = vld [vmem:[#allocation2 + $0x1f8] sm:$0xff] }
 0x3d0   : > { %v2612_v62 = vpop.eup %2611  ;;  %v1588_v63 = vmul.f32 %v2610_v58, %v2598_v40  ;;  %2629 = vpow2.f32 %v1458_v52  ;;  %v1332_v40 = vld [vmem:[#allocation2 + $0x1b0] sm:$0xff]  ;;  %v1334_v58 = vld [vmem:[#allocation2 + $0x1c0] sm:$0xff] }
 0x3d1   : > { %v2614_v0 = vpop.eup %2613  ;;  %2631 = vrcp.f32 %v1494_v59  ;;  %v1466_v59 = vmul.f32 1.442695, %v1404_v45 }
 0x3d2   : > { %v2616_v27 = vpop.eup %2615  ;;  %2165 = vmatprep.mubr.f32.mxu1 %v1588_v63  ;;  %2633 = vtanh.f32 %v1296_v60  ;;  %v1479_v2 = vadd.f32 1.0, %v2614_v0  ;;  %v1405_v63 = vsub.f32 0.0, %v1341_v55 }
 0x3d3   : > { %v1573_v5 = vmul.f32 %v2616_v27, %v2606_v53  ;;  %2635 = vpow2.f32 %v1428_v61  ;;  %v1436_v27 = vmul.f32 1.442695, %v1389_v54 }
 0x3d4   : > { %v2618_v6 = vpop.eup %2617  ;;  %2637 = vrcp.f32 %v1479_v2  ;;  %v1468_v9 = vmul.f32 1.442695, %v1405_v63 }
 0x3d5   : > { %v2620_v11 = vpop.eup %2619  ;;  %2142 = vmatmul.mubr.f32.gmra.mrb[6].mxu0 %v1573_v5  ;;  %v1589_v12 = vmul.f32 %v2618_v6, %v2612_v62  ;;  %2639 = vtanh.f32 %v1328_v3 }
 0x3d6   : > { %v2622_v14 = vpop.eup %2621  ;;  %v1495_v15 = vadd.f32 1.0, %v2620_v11  ;;  %2641 = vpow2.f32 %v1460_v4 }
 0x3d7   : > { %v2624_v16 = vpop.eup %2623  ;;  %2166 = vmatmul.mubr.f32.gmra.mrb[6].mxu1 %v1589_v12  ;;  %2643 = vtanh.f32 %v1298_v7  ;;  %v1336_v7 = vld [vmem:[#allocation2 + $0x1d0] sm:$0xff] }
 0x3d8   : > { %v2626_v19 = vpop.eup %2625  ;;  %2645 = vrcp.f32 %v1495_v15  ;;  %v1480_v20 = vadd.f32 1.0, %v2624_v16  ;;  %v1306_v15 = vld [vmem:[#allocation2 + $0xe0] sm:$0xff] }
 0x3d9   : > { %v2628_v23 = vpop.eup %2627  ;;  %v1574_v24 = vmul.f32 %v2626_v19, %v2622_v14  ;;  %2647 = vpow2.f32 %v1430_v13 }
 0x3da   : > { %v2630_v26 = vpop.eup %2629  ;;  %2649 = vrcp.f32 %v1480_v20 }
 0x3db   : > { %v2632_v8 = vpop.eup %2631  ;;  %2144 = vmatprep.mubr.f32.mxu0 %v1574_v24  ;;  %2651 = vtanh.f32 %v1330_v21  ;;  %v1496_v30 = vadd.f32 1.0, %v2630_v26  ;;  %v1338_v21 = vld [vmem:[#allocation2 + $0x1e0] sm:$0xff] }
 0x3dc   : > { %v2634_v33 = vpop.eup %2633  ;;  %v1590_v34 = vmul.f32 %v2632_v8, %v2628_v23  ;;  %2653 = vpow2.f32 %v1462_v22 }
 0x3dd   : > { %v2636_v35 = vpop.eup %2635  ;;  %2655 = vrcp.f32 %v1496_v30 }
 0x3de   : > { %v2638_v38 = vpop.eup %2637  ;;  %2168 = vmatprep.mubr.f32.mxu1 %v1590_v34  ;;  %2657 = vtanh.f32 %v1300_v31  ;;  %v1481_v39 = vadd.f32 1.0, %v2636_v35  ;;  %v1340_v34 = vld [vmem:[#allocation2 + $0x1f0] sm:$0xff] }
 0x3df   : > { %v2640_v42 = vpop.eup %2639  ;;  %v1575_v43 = vmul.f32 %v2638_v38, %v2634_v33  ;;  %2659 = vpow2.f32 %v1432_v32 }
 0x3e0   : > { %v2642_v44 = vpop.eup %2641  ;;  %2661 = vrcp.f32 %v1481_v39 }
 0x3e1   : > { %v2644_v47 = vpop.eup %2643  ;;  %2145 = vmatmul.mubr.f32.gmra.mrb[8].mxu0 %v1575_v43  ;;  %2663 = vtanh.f32 %v1332_v40  ;;  %v1497_v48 = vadd.f32 1.0, %v2642_v44 }
 0x3e2   : > { %v2646_v51 = vpop.eup %2645  ;;  %2665 = vpow2.f32 %v1464_v41 }
 0x3e3   : > { %v2648_v52 = vpop.eup %2647  ;;  %v1591_v53 = vmul.f32 %v2646_v51, %v2640_v42  ;;  %2667 = vrcp.f32 %v1497_v48 }
 0x3e4   : > { %v2650_v56 = vpop.eup %2649  ;;  %2669 = vtanh.f32 %v1302_v49  ;;  %v1482_v57 = vadd.f32 1.0, %v2648_v52 }
 0x3e5   : > { %v2652_v60 = vpop.eup %2651  ;;  %2169 = vmatmul.mubr.f32.gmra.mrb[8].mxu1 %v1591_v53  ;;  %v1576_v61 = vmul.f32 %v2650_v56, %v2644_v47  ;;  %2671 = vpow2.f32 %v1434_v50  ;;  %v3642_v53 = vld [vmem:[%s3865_s12] ss:$0 sm:$0xff] }
 0x3e6   : > { %v2654_v62 = vpop.eup %2653  ;;  %2673 = vrcp.f32 %v1482_v57 }
 0x3e7   : > { %v2656_v0 = vpop.eup %2655  ;;  %2147 = vmatprep.mubr.f32.mxu0 %v1576_v61  ;;  %2675 = vtanh.f32 %v1334_v58  ;;  %v1498_v25 = vadd.f32 1.0, %v2654_v62 }
 0x3e8   : > { %v2658_v2 = vpop.eup %2657  ;;  %v1592_v3 = vmul.f32 %v2656_v0, %v2652_v60  ;;  %2677 = vpow2.f32 %v1466_v59 }
 0x3e9   : > { %v2660_v4 = vpop.eup %2659  ;;  %2679 = vrcp.f32 %v1498_v25 }
 0x3ea   : > { %v2662_v5 = vpop.eup %2661  ;;  %2171 = vmatprep.mubr.f32.mxu1 %v1592_v3  ;;  %2681 = vtanh.f32 %v1304_v1  ;;  %v1483_v6 = vadd.f32 1.0, %v2660_v4 }
 0x3eb   : > { %v2664_v10 = vpop.eup %2663  ;;  %v1577_v11 = vmul.f32 %v2662_v5, %v2658_v2  ;;  %2683 = vpow2.f32 %v1436_v27 }
 0x3ec   : > { %v2666_v12 = vpop.eup %2665  ;;  %2685 = vrcp.f32 %v1483_v6 }
 0x3ed   : > { %v2668_v13 = vpop.eup %2667  ;;  %2148 = vmatmul.mubr.f32.gmra.mrb[10].mxu0 %v1577_v11  ;;  %2687 = vtanh.f32 %v1336_v7  ;;  %v1499_v14 = vadd.f32 1.0, %v2666_v12 }
 0x3ee   : > { %v2670_v16 = vpop.eup %2669  ;;  %v1593_v17 = vmul.f32 %v2668_v13, %v2664_v10  ;;  %2689 = vpow2.f32 %v1468_v9 }
 0x3ef   : > { %v2672_v18 = vpop.eup %2671  ;;  %2691 = vrcp.f32 %v1499_v14 }
 0x3f0   : > { %v2674_v19 = vpop.eup %2673  ;;  %2172 = vmatmul.mubr.f32.gmra.mrb[10].mxu1 %v1593_v17  ;;  %2693 = vtanh.f32 %v1306_v15  ;;  %v1484_v20 = vadd.f32 1.0, %v2672_v18 }
 0x3f1   : > { %v2676_v22 = vpop.eup %2675  ;;  %v1578_v23 = vmul.f32 %v2674_v19, %v2670_v16 }
 0x3f2   : > { %v2678_v24 = vpop.eup %2677  ;;  %2695 = vrcp.f32 %v1484_v20 }
 0x3f3   : > { %v2680_v26 = vpop.eup %2679  ;;  %2150 = vmatprep.mubr.f32.mxu0 %v1578_v23  ;;  %2697 = vtanh.f32 %v1338_v21  ;;  %v1500_v28 = vadd.f32 1.0, %v2678_v24 }
 0x3f4   : > { %v2682_v8 = vpop.eup %2681  ;;  %v1594_v30 = vmul.f32 %v2680_v26, %v2676_v22 }
 0x3f5   : > { %v2684_v31 = vpop.eup %2683  ;;  %2699 = vrcp.f32 %v1500_v28 }
 0x3f6   : > { %v2686_v32 = vpop.eup %2685  ;;  %2174 = vmatprep.mubr.f32.mxu1 %v1594_v30  ;;  %2701 = vtanh.f32 %v1308_v29  ;;  %v1485_v33 = vadd.f32 1.0, %v2684_v31 }
 0x3f7   : > { %v2688_v35 = vpop.eup %2687  ;;  %v1579_v36 = vmul.f32 %v2686_v32, %v2682_v8 }
 0x3f8   : > { %v2690_v37 = vpop.eup %2689  ;;  %2703 = vrcp.f32 %v1485_v33 }
 0x3f9   : > { %v2692_v38 = vpop.eup %2691  ;;  %2151 = vmatmul.mubr.f32.gmra.mrb[12].mxu0 %v1579_v36  ;;  %2705 = vtanh.f32 %v1340_v34  ;;  %v1501_v39 = vadd.f32 1.0, %v2690_v37 }
 0x3fa   : > { %v2694_v40 = vpop.eup %2693  ;;  %v1595_v41 = vmul.f32 %v2692_v38, %v2688_v35 }
 0x3fb   : > { %2707 = vrcp.f32 %v1501_v39 }
 0x3fc   : > { %v2696_v42 = vpop.eup %2695  ;;  %2175 = vmatmul.mubr.f32.gmra.mrb[12].mxu1 %v1595_v41 }
 0x3fd   : > { %v2698_v43 = vpop.eup %2697  ;;  %v1580_v44 = vmul.f32 %v2696_v42, %v2694_v40 }
 0x3ff   : > { %v2700_v45 = vpop.eup %2699  ;;  %2153 = vmatprep.mubr.f32.mxu0 %v1580_v44 }
 0x400   : > { %v2702_v46 = vpop.eup %2701  ;;  %v1596_v47 = vmul.f32 %v2700_v45, %v2698_v43 }
 0x402   : > { %v2704_v48 = vpop.eup %2703  ;;  %2177 = vmatprep.mubr.f32.mxu1 %v1596_v47 }
 0x403   : > { %v2706_v49 = vpop.eup %2705  ;;  %v1581_v50 = vmul.f32 %v2704_v48, %v2702_v46 }
 0x405   : > { %v2708_v51 = vpop.eup %2707  ;;  %2154 = vmatmul.mubr.f32.gmra.mrb[14].mxu0 %v1581_v50 }
 0x406   : > { %v1597_v52 = vmul.f32 %v2708_v51, %v2706_v49 }
 0x408   : > { %2178 = vmatmul.mubr.f32.gmra.mrb[14].mxu1 %v1597_v52 }
 0x487   : > { %v2134_v54 = vpop.f32.mrb[0].mxu0 }
 0x488   : > { %v1693_v55 = vadd.f32 %v2134_v54, %v3642_v53  ;;  %v2158_v56 = vpop.f32.mrb[0].mxu1  ;;  %v1687_v57 = vpop.f32.mrb[1].mxu0 }
 0x489   : > { %v1773_v58 = vadd.f32 %v2158_v56, %v3642_v53  ;;  %v1688_v59 = vadd.f32 %v3642_v53, %v1687_v57  ;;  %v1767_v60 = vpop.f32.mrb[1].mxu1 }
 0x48a   : > { %1847 = vst [vmem:[%s3366_s19 + $0x8] sm:$0xff] %v1693_v55  ;;  %v1768_v61 = vadd.f32 %v3642_v53, %v1767_v60 }
 0x48b   : > { %1863 = vst [vmem:[%s3366_s19 + $0x88] sm:$0xff] %v1773_v58  ;;  %1846 = vst [vmem:[%s3366_s19] sm:$0xff] %v1688_v59 }
 0x48c   : > { %1862 = vst [vmem:[%s3366_s19 + $0x80] sm:$0xff] %v1768_v61 }
 0x48e   : > { %v2137_v62 = vpop.f32.mrb[2].mxu0 }
 0x48f   : > { %v1703_v63 = vadd.f32 %v2137_v62, %v3642_v53  ;;  %v1697_v0 = vpop.f32.mrb[3].mxu0  ;;  %v2161_v25 = vpop.f32.mrb[2].mxu1 }
 0x490   : > { %v1698_v1 = vadd.f32 %v3642_v53, %v1697_v0  ;;  %v1783_v27 = vadd.f32 %v2161_v25, %v3642_v53  ;;  %v1777_v2 = vpop.f32.mrb[3].mxu1 }
 0x491   : > { %1849 = vst [vmem:[%s3366_s19 + $0x18] sm:$0xff] %v1703_v63  ;;  %v1778_v3 = vadd.f32 %v3642_v53, %v1777_v2 }
 0x492   : > { %1848 = vst [vmem:[%s3366_s19 + $0x10] sm:$0xff] %v1698_v1  ;;  %1865 = vst [vmem:[%s3366_s19 + $0x98] sm:$0xff] %v1783_v27 }
 0x493   : > { %1864 = vst [vmem:[%s3366_s19 + $0x90] sm:$0xff] %v1778_v3 }
 0x49e   : > { %v2140_v4 = vpop.f32.mrb[4].mxu0 }
 0x49f   : > { %v1713_v5 = vadd.f32 %v2140_v4, %v3642_v53  ;;  %v1707_v6 = vpop.f32.mrb[5].mxu0 }
 0x4a0   : > { %v2164_v7 = vpop.f32.mrb[4].mxu1  ;;  %v1708_v9 = vadd.f32 %v3642_v53, %v1707_v6 }
 0x4a1   : > { %1851 = vst [vmem:[%s3366_s19 + $0x28] sm:$0xff] %v1713_v5  ;;  %v1793_v10 = vadd.f32 %v2164_v7, %v3642_v53  ;;  %v1787_v11 = vpop.f32.mrb[5].mxu1 }
 0x4a2   : > { %1850 = vst [vmem:[%s3366_s19 + $0x20] sm:$0xff] %v1708_v9  ;;  %v1788_v12 = vadd.f32 %v3642_v53, %v1787_v11 }
 0x4a3   : > { %1867 = vst [vmem:[%s3366_s19 + $0xa8] sm:$0xff] %v1793_v10 }
 0x4a4   : > { %1866 = vst [vmem:[%s3366_s19 + $0xa0] sm:$0xff] %v1788_v12 }
 0x4a8   : > { %v2143_v13 = vpop.f32.mrb[6].mxu0 }
 0x4a9   : > { %v1723_v14 = vadd.f32 %v2143_v13, %v3642_v53  ;;  %v1717_v15 = vpop.f32.mrb[7].mxu0 }
 0x4aa   : > { %v2167_v16 = vpop.f32.mrb[6].mxu1  ;;  %v1718_v17 = vadd.f32 %v3642_v53, %v1717_v15 }
 0x4ab   : > { %1853 = vst [vmem:[%s3366_s19 + $0x38] sm:$0xff] %v1723_v14  ;;  %v1803_v18 = vadd.f32 %v2167_v16, %v3642_v53  ;;  %v1797_v19 = vpop.f32.mrb[7].mxu1 }
 0x4ac   : > { %1852 = vst [vmem:[%s3366_s19 + $0x30] sm:$0xff] %v1718_v17  ;;  %v1798_v20 = vadd.f32 %v3642_v53, %v1797_v19 }
 0x4ad   : > { %1869 = vst [vmem:[%s3366_s19 + $0xb8] sm:$0xff] %v1803_v18 }
 0x4ae   : > { %1868 = vst [vmem:[%s3366_s19 + $0xb0] sm:$0xff] %v1798_v20 }
 0x4b4   : > { %v2146_v21 = vpop.f32.mrb[8].mxu0 }
 0x4b5   : > { %v1733_v22 = vadd.f32 %v2146_v21, %v3642_v53  ;;  %v1727_v23 = vpop.f32.mrb[9].mxu0 }
 0x4b6   : > { %v1728_v24 = vadd.f32 %v3642_v53, %v1727_v23 }
 0x4b7   : > { %1855 = vst [vmem:[%s3366_s19 + $0x48] sm:$0xff] %v1733_v22 }
 0x4b8   : > { %v2170_v26 = vpop.f32.mrb[8].mxu1  ;;  %1854 = vst [vmem:[%s3366_s19 + $0x40] sm:$0xff] %v1728_v24 }
 0x4b9   : > { %v1813_v28 = vadd.f32 %v2170_v26, %v3642_v53  ;;  %v1807_v29 = vpop.f32.mrb[9].mxu1 }
 0x4ba   : > { %v1808_v8 = vadd.f32 %v3642_v53, %v1807_v29 }
 0x4bb   : > { %1871 = vst [vmem:[%s3366_s19 + $0xc8] sm:$0xff] %v1813_v28 }
 0x4bc   : > { %1870 = vst [vmem:[%s3366_s19 + $0xc0] sm:$0xff] %v1808_v8 }
 0x4c0   : > { %v2149_v30 = vpop.f32.mrb[10].mxu0 }
 0x4c1   : > { %v1743_v31 = vadd.f32 %v2149_v30, %v3642_v53  ;;  %v1737_v32 = vpop.f32.mrb[11].mxu0 }
 0x4c2   : > { %v1738_v33 = vadd.f32 %v3642_v53, %v1737_v32 }
 0x4c3   : > { %1857 = vst [vmem:[%s3366_s19 + $0x58] sm:$0xff] %v1743_v31  ;;  %v2173_v34 = vpop.f32.mrb[10].mxu1 }
 0x4c4   : > { %v1823_v35 = vadd.f32 %v2173_v34, %v3642_v53  ;;  %1856 = vst [vmem:[%s3366_s19 + $0x50] sm:$0xff] %v1738_v33  ;;  %v1817_v36 = vpop.f32.mrb[11].mxu1 }
 0x4c5   : > { %v1818_v37 = vadd.f32 %v3642_v53, %v1817_v36 }
 0x4c6   : > { %1873 = vst [vmem:[%s3366_s19 + $0xd8] sm:$0xff] %v1823_v35 }
 0x4c7   : > { %1872 = vst [vmem:[%s3366_s19 + $0xd0] sm:$0xff] %v1818_v37 }
 0x4cc   : > { %v2152_v38 = vpop.f32.mrb[12].mxu0 }
 0x4cd   : > { %v1753_v39 = vadd.f32 %v2152_v38, %v3642_v53  ;;  %v1747_v40 = vpop.f32.mrb[13].mxu0 }
 0x4ce   : > { %v1748_v41 = vadd.f32 %v3642_v53, %v1747_v40 }
 0x4cf   : > { %1859 = vst [vmem:[%s3366_s19 + $0x68] sm:$0xff] %v1753_v39  ;;  %v2176_v42 = vpop.f32.mrb[12].mxu1 }
 0x4d0   : > { %v1833_v43 = vadd.f32 %v2176_v42, %v3642_v53  ;;  %1858 = vst [vmem:[%s3366_s19 + $0x60] sm:$0xff] %v1748_v41  ;;  %v1827_v44 = vpop.f32.mrb[13].mxu1 }
 0x4d1   : > { %v1828_v45 = vadd.f32 %v3642_v53, %v1827_v44 }
 0x4d2   : > { %1875 = vst [vmem:[%s3366_s19 + $0xe8] sm:$0xff] %v1833_v43 }
 0x4d3   : > { %1874 = vst [vmem:[%s3366_s19 + $0xe0] sm:$0xff] %v1828_v45 }
 0x4d8   : > { %v2155_v46 = vpop.f32.mrb[14].mxu0 }
 0x4d9   : > { %v1763_v47 = vadd.f32 %v2155_v46, %v3642_v53  ;;  %v1757_v48 = vpop.f32.mrb[15].mxu0 }
 0x4da   : > { %v1758_v49 = vadd.f32 %v3642_v53, %v1757_v48 }
 0x4db   : > { %1861 = vst [vmem:[%s3366_s19 + $0x78] sm:$0xff] %v1763_v47  ;;  %v2179_v50 = vpop.f32.mrb[14].mxu1 }
 0x4dc   : > { %v1843_v51 = vadd.f32 %v2179_v50, %v3642_v53  ;;  %1860 = vst [vmem:[%s3366_s19 + $0x70] sm:$0xff] %v1758_v49  ;;  %v1837_v52 = vpop.f32.mrb[15].mxu1 }
 0x4dd   : > { %v1838_v54 = vadd.f32 %v3642_v53, %v1837_v52 }
 0x4de   : > { %1877 = vst [vmem:[%s3366_s19 + $0xf8] sm:$0xff] %v1843_v51 }
 0x4df   : > { %1876 = vst [vmem:[%s3366_s19 + $0xf0] sm:$0xff] %v1838_v54 }
 0x4e0 PF: > { %s3866_s21 = sld [smem:[#allocation20_spill]]  ;;  %s3867_s24 = sld [smem:[#allocation21_spill]] }
 0x4e1   : > { %s3868_s29 = sld [smem:[#allocation33_spill]]  ;;  %s1892_s27 = sshll.u32 %s3366_s19, 4  ;;  %s3715_s27 = int_to_ptr.vmem [resolvable:$true] %s1892_s27 }
 0x4e2   : > { %s3719_s18 = scalar_lea.sflag [#allocation5], %s353_s13  ;;  %s2825_s7 = scalar_lea.vmem %s3715_s27, 4096 }
 0x4e3   : > { %p2826_p5 = scmp.ne.s32.totalorder %s3715_s27, %s2825_s7  ;;  %s2996_s3 = smov [#allocation11]  }
 0x4e4   : > { %s2829_s15 = sshll.u32 %s2996_s3, 4  ;;  %s2830_s15 = int_to_ptr.vmem [resolvable:$false] %s2829_s15 }
 0x4e5   : > { %s2831_s11 = scalar_lea.vmem %s2830_s15, 8192  ;;  %p2832_p0 = scmp.lt.s32.totalorder %s3715_s27, %s2830_s15 }
 0x4e6   : > { %s2051_s6 = sshll.u32 %s3866_s21, 12  ;;  %p3870_p10 = scmp.ne.s32.totalorder %s3867_s24, 0 }
 0x4e7   : > { %s3869_s4 = smov %s3868_s29  ;;  %s3712_s14 = scalar_lea.hbm %s3868_s29, %s2051_s6 }
 0x4e8   : > { %p2827_p2 = pnand %p2826_p5, %p3870_p10  ;;  %p2833_p8 = scmp.lt.s32.totalorder %s2831_s11, %s2825_s7 }
 0x4ea   : > { %p2828_p13 = pneg %p2827_p2  ;;  %p2834_p11 = por %p2833_p8, %p2832_p0 }
 0x4ec   : > { %p2835_p12 = pnand %p2834_p11, %p2828_p13 }
 0x4ee   : > { %2838 = shalt.err (!%p2835_p12)
}
 0x4ef   : > { %s2839_s13 = scalar_lea.hbm %s3712_s14, 4096  ;;  %s2843_s2 = scalar_lea.hbm %s3869_s4, 8192 }
 0x4f0   : > { %p2840_p7 = scmp.ne.s32.totalorder %s3712_s14, %s2839_s13  ;;  %p2844_p1 = scmp.lt.u32.totalorder %s3712_s14, %s3869_s4 }
 0x4f1   : > { %p2845_p6 = scmp.lt.u32.totalorder %s2843_s2, %s2839_s13  ;;  %p2847_p5 = scmp.lt.u32.totalorder %s2839_s13, %s3712_s14 }
 0x4f2   : > { %p2841_p9 = pnand %p2840_p7, %p3870_p10 }
 0x4f3   : > { %p2846_p4 = por %p2845_p6, %p2844_p1 }
 0x4f4   : > { %p2842_p3 = pneg %p2841_p9 }
 0x4f5   : > { %p2848_p2 = por %p2847_p5, %p2846_p4 }
 0x4f7   : > { %p2849_p13 = pnand %p2848_p2, %p2842_p3 }
 0x4f9   : > { %2852 = shalt.err (!%p2849_p13)
}
 0x4fa   : > { %s2997_s5 = smov 128   ;;  %s2998_s12 = smov 8  }
 0x4fb   : > { %2368 = dma.vmem_to_hbm [thread:$0]  (%p3870_p10), %s3715_s27, 4096, %s3712_s14, %s3719_s18, %s2997_s5, %s2997_s5, %s2998_s12  }
 0x4fc PF: > { %s3871_s21 = sld [smem:[#allocation17_spill]]  ;;  %s3872_s6 = sld [smem:[#allocation22_spill]] }
 0x4fd   : > { %p2393_p0 = scmp.ge.s32.totalorder %s2983_s10, 2 }
 0x502   : > { %s1907_s20 = sand.u32 1, %s3871_s21   ;;  %p3873_p8 = scmp.ne.s32.totalorder %s3872_s6, 0 }
 0x503   : > { %s1908_s0 = scalar_lea.sflag [#allocation5], %s1907_s20 }
 0x504   : > { %p2385_p11 = pnand %p2393_p0, %p3873_p8 }
 0x506   : > { %2926 = dma.done.wait (!%p2385_p11), %s1908_s0, 4096  }
 0x507   : > { %2928 = vsyncadd (!%p2385_p11), %s1908_s0, 4294963200  ;;  %s26_s10 = sadd.s32 1, %s2983_s10   ;;  %s3875_s24 = sld [smem:[#allocation26_spill]] }
 0x508   : > { %p3748_p12 = scmp.ge.s32.totalorder %s26_s10, 6   ;;  %s3876_s14 = sld [smem:[#allocation27_spill]] }
 0x509   : > { %s3877_s18 = sld [smem:[#allocation18_spill]]  ;;  %s3878_s7 = sld [smem:[#allocation25_spill]] }
 0x50a   : > { %s3879_s3 = sld [smem:[#allocation23_spill]]  ;;  %s3880_s15 = sld [smem:[#allocation24_spill]] }
 0x50b   : > { %s3882_s21 = smov %s2935_s22  ;;  %s3883_s22 = smov %s2939_s23 }
 0x50c   : > { %s3888_s27 = smov %s2959_s28  ;;  %s3891_s30 = smov %s2975_s8 }
 0x50d   : > { %s3884_s23 = smov %s3875_s24  ;;  %s3885_s24 = smov %s2947_s25 }
 0x50e   : > { %s3886_s25 = smov %s2951_s26  ;;  %s3887_s26 = smov %s3876_s14 }
 0x50f   : > { %s3889_s28 = smov %s3877_s18  ;;  %s3890_s29 = smov %s3878_s7 }
 0x510   : > { %s3892_s7 = smov %s2979_s9  ;;  %s3893_s8 = smov %s3879_s3 }
 0x511   : > { %s3894_s9 = smov %s3880_s15  ;;  %25 = sbr.rel (!%p3748_p12) target bundleno = 20 (0x14), region = 118 }
 0x518   :  { %1913 = vsyncpa [#allocation4], 1 }
 0x519   :  { %1915 = vsyncpa [#allocation4 + $0x1], 1 }
 0x51a   :  { %1916 = vsyncpa [#allocation7], 1 }
 0x51b   :  { %1918 = vsyncpa [#allocation7 + $0x1], 1 }
 0x51c   :  { %1919 = vsyncpa [#allocation10], 1 }
 0x51d   :  { %1920 = vsyncpa [#allocation5], 1 }
 0x51e   :  { %1922 = vsyncpa [#allocation5 + $0x1], 1 }

</bundles_post_ra>
